<compile_context>
chip_gen: v6e
topology: v6e:2x2x1
jax: 0.10.0
libtpu: 0.0.40
codegen_flags: <defaults>
</compile_context>

<pallas_src>
import functools
import math

import jax
import jax.numpy as jnp
from jax import lax
from jax.experimental import pallas as pl
from jax.experimental.pallas import tpu as pltpu

EPS = 1e-8
_DEGEN_R2 = 1e-12   # guard for degenerate (coincident-point) minimal samples
_DIAG_TH = 1e-4     # remove_bad_models threshold on |diag| (== |cos(theta)| for rigid)


# ----------------------------------------------------------------------------
# Fused Pallas kernel: 2-point rigid solver + (rigid-specialized) verification
# ----------------------------------------------------------------------------
def _gen_verify_kernel(samp_ref, kp_ref, score_ref, *, fwd_th):
    s = samp_ref[...]                                 # (8, TM): params on sublanes
    x1a = s[0:1, :]; y1a = s[1:2, :]
    x1b = s[2:3, :]; y1b = s[3:4, :]
    x2a = s[4:5, :]; y2a = s[5:6, :]
    x2b = s[6:7, :]; y2b = s[7:8, :]

    # --- minimal rigid solver (2D Kabsch / Procrustes, det(R) = +1) ---
    c1x = 0.5 * (x1a + x1b); c1y = 0.5 * (y1a + y1b)
    c2x = 0.5 * (x2a + x2b); c2y = 0.5 * (y2a + y2b)
    d1x = x1b - x1a; d1y = y1b - y1a
    d2x = x2b - x2a; d2y = y2b - y2a

    a = d1x * d2x + d1y * d2y                         # d1 . d2  -> cos
    b = d1x * d2y - d1y * d2x                         # d1 x d2  -> sin
    r2 = a * a + b * b
    # rsqrt goes to the EUP slot; guard degenerate samples (r2 ~ 0) explicitly.
    inv_r = jnp.where(r2 > _DEGEN_R2, lax.rsqrt(r2), jnp.zeros_like(r2))
    cs = a * inv_r                                    # (1, TM)
    sn = b * inv_r
    tx = c2x - (cs * c1x - sn * c1y)
    ty = c2y - (sn * c1x + cs * c1y)

    kp = kp_ref[...]                                  # (N, 8): [x1 y1 x2 y2 0 0 0 0]
    x1 = kp[:, 0:1]; y1 = kp[:, 1:2]                  # (N, 1)
    x2 = kp[:, 2:3]; y2 = kp[:, 3:4]

    # Forward transfer error only: for an orthonormal R the backward residual
    # |R^T (p2 - t) - p1| has exactly the same norm as |R p1 + t - p2|, so the
    # symmetric error equals 2 * forward; the factor 2 is folded into fwd_th.
    ex = (x1 * cs - y1 * sn + tx) - x2                # (N, TM)
    ey = (x1 * sn + y1 * cs + ty) - y2
    err = ex * ex + ey * ey

    inl = (err <= fwd_th).astype(jnp.float32)
    count = jnp.sum(inl, axis=0, keepdims=True)       # (1, TM): lane-dense scores

    # remove_bad_models fused in: for a rigid model the diagonal is (cs, cs, 1),
    # so min(|diag|) > 1e-4  <=>  |cs| > 1e-4.  Degenerate samples (cs = sn = 0)
    # are rejected here as well (their wrong raw err never matters).
    valid = jnp.abs(cs) > _DIAG_TH
    score_ref[...] = jnp.where(valid, count, -jnp.ones_like(count))


def _round_up(x, m):
    return ((x + m - 1) // m) * m


def _pick_tile(n_models, n_pts, tile):
    # Keep ~5 live (N, TM) f32 temporaries under ~10 MiB so the kernel stays far
    # inside the scoped-VMEM default (32 MiB) on every generation (incl. v7x's
    # smaller 64 MiB physical VMEM), even with double-buffered inputs.
    budget = 10 * 1024 * 1024
    per_col = 5 * 4 * max(int(n_pts), 1)
    vmem_tm = max(128, (budget // per_col) // 128 * 128)
    tm = min(int(tile), vmem_tm, _round_up(int(n_models), 128))
    return max(128, tm)


def gen_verify_scores(samp_t, kp_pts, inl_th, *, tile=1024):
    """Fused minimal-solver + verification.

    samp_t : (8, B)  minimal samples (x1a,y1a,x1b,y1b,x2a,y2a,x2b,y2b) per model.
    kp_pts : (N, 8)  correspondences packed as [x1, y1, x2, y2, 0, 0, 0, 0].
    Returns per-model inlier counts (B,) with invalid models forced to -1.
    """
    B0 = samp_t.shape[1]
    N = kp_pts.shape[0]
    tm = _pick_tile(B0, N, tile)
    pad = (-B0) % tm
    if pad:
        samp_t = jnp.pad(samp_t, ((0, 0), (0, pad)), mode="edge")
    B = B0 + pad
    kernel = functools.partial(_gen_verify_kernel, fwd_th=float(inl_th) * 0.5)
    scores = pl.pallas_call(
        kernel,
        out_shape=jax.ShapeDtypeStruct((1, B), jnp.float32),
        grid_spec=pltpu.PrefetchScalarGridSpec(
            num_scalar_prefetch=0,
            grid=(B // tm,),
            in_specs=[pl.BlockSpec((8, tm), lambda i: (0, i)),
                      pl.BlockSpec((N, 8), lambda i: (0, 0))],
            out_specs=pl.BlockSpec((1, tm), lambda i: (0, i)),
        ),
        compiler_params=pltpu.CompilerParams(dimension_semantics=("parallel",)),
    )(samp_t, kp_pts)
    # TODO(synk): for very large N (tens of thousands of correspondences) add a
    # second trailing "arbitrary" grid axis over N with a (1, TM) VMEM accumulator.
    return scores[0, :B0]


# ----------------------------------------------------------------------------
# Plain-JAX helpers (run inside the single jitted RANSAC dispatch)
# ----------------------------------------------------------------------------
def _rigid_from_sample_row(s):
    """Rebuild the 3x3 rigid model for one minimal-sample row (same math as kernel)."""
    x1a, y1a, x1b, y1b, x2a, y2a, x2b, y2b = (s[i] for i in range(8))
    c1x = 0.5 * (x1a + x1b); c1y = 0.5 * (y1a + y1b)
    c2x = 0.5 * (x2a + x2b); c2y = 0.5 * (y2a + y2b)
    d1x = x1b - x1a; d1y = y1b - y1a
    d2x = x2b - x2a; d2y = y2b - y2a
    a = d1x * d2x + d1y * d2y
    b = d1x * d2y - d1y * d2x
    r2 = a * a + b * b
    inv_r = jnp.where(r2 > _DEGEN_R2, lax.rsqrt(r2), jnp.zeros_like(r2))
    cs = a * inv_r
    sn = b * inv_r
    tx = c2x - (cs * c1x - sn * c1y)
    ty = c2y - (sn * c1x + cs * c1y)
    row0 = jnp.stack([cs, -sn, tx])
    row1 = jnp.stack([sn, cs, ty])
    row2 = jnp.array([0.0, 0.0, 1.0], s.dtype)
    return jnp.stack([row0, row1, row2])


def _inv3x3(H):
    """Adjugate 3x3 inverse (matches torch.inverse for well-conditioned H)."""
    h00, h01, h02 = H[0, 0], H[0, 1], H[0, 2]
    h10, h11, h12 = H[1, 0], H[1, 1], H[1, 2]
    h20, h21, h22 = H[2, 0], H[2, 1], H[2, 2]
    c00 = h11 * h22 - h12 * h21
    c01 = h02 * h21 - h01 * h22
    c02 = h01 * h12 - h02 * h11
    c10 = h12 * h20 - h10 * h22
    c11 = h00 * h22 - h02 * h20
    c12 = h02 * h10 - h00 * h12
    c20 = h10 * h21 - h11 * h20
    c21 = h01 * h20 - h00 * h21
    c22 = h00 * h11 - h01 * h10
    det = h00 * c00 + h01 * c10 + h02 * c20
    adj = jnp.stack([jnp.stack([c00, c01, c02]),
                     jnp.stack([c10, c11, c12]),
                     jnp.stack([c20, c21, c22])])
    return adj / det


def _sym_transfer_error_single(kp1, kp2, H, squared=True):
    """Symmetric transfer error of one 3x3 model against (N, 2) correspondences."""
    ones = jnp.ones((kp1.shape[0], 1), kp1.dtype)
    p1h = jnp.concatenate([kp1, ones], axis=-1)
    p2h = jnp.concatenate([kp2, ones], axis=-1)
    Hinv = _inv3x3(H)

    def oneway(A, src_h, dst):
        t = src_h @ A.T
        z = t[:, 2:3]
        scale = jnp.where(jnp.abs(z) > EPS, 1.0 / (z + EPS), jnp.ones_like(z))
        d = t[:, :2] * scale - dst
        return jnp.sum(d * d, axis=-1)

    err = oneway(H, p1h, kp2) + oneway(Hinv, p2h, kp1)
    return err if squared else jnp.sqrt(err)


def _weighted_rigid(kp1, kp2, mask, w):
    """find_rigid on the mask-selected subset with per-point weights w (fixed shapes).

    Matches the reference: centroids are the (unweighted) mean over the selected
    points; the weights only scale the covariance terms.
    """
    msum = jnp.maximum(jnp.sum(mask), 1.0)
    c1 = jnp.sum(kp1 * mask[:, None], axis=0) / msum
    c2 = jnp.sum(kp2 * mask[:, None], axis=0) / msum
    p1c = kp1 - c1
    p2c = kp2 - c2
    ww = mask * w
    a = jnp.sum(ww * (p1c[:, 0] * p2c[:, 0] + p1c[:, 1] * p2c[:, 1]))
    b = jnp.sum(ww * (p1c[:, 0] * p2c[:, 1] - p1c[:, 1] * p2c[:, 0]))
    r2 = a * a + b * b
    inv_r = jnp.where(r2 > _DEGEN_R2, lax.rsqrt(r2), jnp.zeros_like(r2))
    cs = a * inv_r
    sn = b * inv_r
    tx = c2[0] - (cs * c1[0] - sn * c1[1])
    ty = c2[1] - (sn * c1[0] + cs * c1[1])
    row0 = jnp.stack([cs, -sn, tx])
    row1 = jnp.stack([sn, cs, ty])
    row2 = jnp.array([0.0, 0.0, 1.0], kp1.dtype)
    return jnp.stack([row0, row1, row2])


def _polish_model(kp1, kp2, inliers, soft_inl_th=3.0, n_iter=5):
    """find_rigid_iterated on the inlier subset (mask-weighted, fixed shapes)."""
    mask = inliers.astype(jnp.float32)
    w = jnp.ones_like(mask)
    H = _weighted_rigid(kp1, kp2, mask, w)
    for _ in range(n_iter - 1):
        err = _sym_transfer_error_single(kp1, kp2, H, squared=False)
        w = jnp.exp(-err / (2.0 * soft_inl_th ** 2))
        H = _weighted_rigid(kp1, kp2, mask, w)
    return H


# ----------------------------------------------------------------------------
# Full RANSAC loop (sample -> Pallas -> argmax -> LO -> early stop) in ONE jit
# ----------------------------------------------------------------------------
def _make_ransac_fn(batch_size, inl_th, max_iter, confidence, max_lo_iters, tile):
    inl_th = float(inl_th)
    sample_size = 2
    log1mc = math.log(1.0 - confidence)

    def run(key, kp1, kp2, kp_pts):
        num_tc = kp1.shape[0]

        def sample_minimal(k):
            # top-2 without sort: two argmax passes over a uniform random matrix
            rand = jax.random.uniform(k, (batch_size, num_tc))
            i1 = jnp.argmax(rand, axis=1)
            hit = jnp.arange(num_tc)[None, :] == i1[:, None]
            i2 = jnp.argmax(jnp.where(hit, -1.0, rand), axis=1)
            idxs = jnp.stack([i1, i2], axis=1)                 # (B, 2)
            p1s = kp1[idxs].reshape(batch_size, 4)
            p2s = kp2[idxs].reshape(batch_size, 4)
            return jnp.concatenate([p1s, p2s], axis=1).T       # (8, B)

        def run_lo(args):
            model0, inliers0, score0 = args

            def lo_cond(carry):
                it, _, _, _, cont = carry
                return jnp.logical_and(it < max_lo_iters, cont)

            def lo_body(carry):
                it, model_c, inliers_c, score_c, _ = carry
                H_lo = _polish_model(kp1, kp2, inliers_c)
                err_lo = _sym_transfer_error_single(kp1, kp2, H_lo, squared=True)
                inl_lo = err_lo <= inl_th
                score_lo = jnp.sum(inl_lo.astype(jnp.float32))
                better = score_lo > score_c
                model_c = jnp.where(better, H_lo, model_c)
                inliers_c = jnp.where(better, inl_lo, inliers_c)
                score_c = jnp.where(better, score_lo, score_c)
                return it + 1, model_c, inliers_c, score_c, better

            carry0 = (jnp.int32(0), model0, inliers0, score0, jnp.bool_(True))
            _, m1, in1, s1, _ = lax.while_loop(lo_cond, lo_body, carry0)
            return m1, in1, s1

        def body(carry):
            i, k, best_model, best_inliers, best_score, _ = carry
            k, sk = jax.random.split(k)
            samp_t = sample_minimal(sk)

            # fused Pallas: solve + verify + degenerate mask -> per-model score
            scores = gen_verify_scores(samp_t, kp_pts, inl_th, tile=tile)   # (B,)
            best_idx = jnp.argmax(scores)
            model_score = scores[best_idx]
            model = _rigid_from_sample_row(samp_t[:, best_idx])             # (3, 3)
            err = _sym_transfer_error_single(kp1, kp2, model, squared=True)
            inliers = err <= inl_th

            improved = model_score > best_score
            model, inliers, model_score = lax.cond(
                improved, run_lo, lambda a: a, (model, inliers, model_score))

            new_model = jnp.where(improved, model, best_model)
            new_inliers = jnp.where(improved, inliers, best_inliers)
            new_score = jnp.where(improved, model_score, best_score)

            # confidence-based early stop (only checked when improved, as in ref)
            ratio = jnp.floor(new_score) / float(num_tc)
            denom = jnp.log1p(-jnp.minimum(ratio ** sample_size, 1.0))
            new_max_iter = log1mc / denom            # -> 0 when all points inliers
            done = jnp.asarray((i + 1) * batch_size, jnp.float32) >= new_max_iter
            keep_going = jnp.logical_not(jnp.logical_and(improved, done))
            return i + 1, k, new_model, new_inliers, new_score, keep_going

        def cond(carry):
            i, _, _, _, _, keep_going = carry
            return jnp.logical_and(i < max_iter, keep_going)

        init = (jnp.int32(0), key,
                jnp.zeros((3, 3), jnp.float32),
                jnp.zeros((num_tc,), bool),
                jnp.float32(sample_size),
                jnp.bool_(True))
        _, _, best_model, best_inliers, best_score, _ = lax.while_loop(
            cond, body, init)
        return best_model, best_inliers, best_score

    return jax.jit(run)


# ----------------------------------------------------------------------------
# RANSAC module (model_type='rigid')
# ----------------------------------------------------------------------------
class RansacRigid:
    """JAX/Pallas port of kornia's RANSAC module with model_type='rigid'."""
    # TODO(synk): 'homography'/'affine'/'fundamental' solvers (DLT + SVD / LU)
    #             are not ported; only the 'rigid' branch is implemented.

    def __init__(self, inl_th=2.0, batch_size=2048, max_iter=10,
                 confidence=0.999, max_lo_iters=5, tile=1024):
        self.inl_th = float(inl_th)
        self.batch_size = int(batch_size)
        self.max_iter = int(max_iter)
        self.confidence = float(confidence)
        self.max_lo_iters = int(max_lo_iters)
        self.minimal_sample_size = 2
        self.tile = int(tile)
        self._run = _make_ransac_fn(self.batch_size, self.inl_th, self.max_iter,
                                    self.confidence, self.max_lo_iters, self.tile)

    @staticmethod
    def max_samples_by_conf(n_inl, num_tc, sample_size, conf):
        if n_inl == num_tc:
            return 1.0
        return math.log(1.0 - conf) / math.log(
            1.0 - math.pow(n_inl / num_tc, sample_size))

    def __call__(self, kp1, kp2, key):
        kp1 = jnp.asarray(kp1, jnp.float32)
        kp2 = jnp.asarray(kp2, jnp.float32)
        n = kp1.shape[0]
        # fused correspondence buffer for the kernel: [x1, y1, x2, y2, pad x4]
        kp_pts = jnp.concatenate(
            [kp1, kp2, jnp.zeros((n, 4), jnp.float32)], axis=1)     # (N, 8)
        model, inliers, _ = self._run(key, kp1, kp2, kp_pts)
        return model, inliers


if __name__ == "__main__":
    key = jax.random.PRNGKey(0)
    N = 128
    k1, k2, k3, k4, k5 = jax.random.split(key, 5)

    kp1 = jax.random.uniform(k1, (N, 2), jnp.float32, 0.0, 100.0)
    theta = 0.3
    R = jnp.array([[jnp.cos(theta), -jnp.sin(theta)],
                   [jnp.sin(theta), jnp.cos(theta)]], jnp.float32)
    t = jnp.array([5.0, -3.0], jnp.float32)
    kp2_clean = kp1 @ R.T + t
    noise = 0.3 * jax.random.normal(k2, (N, 2), jnp.float32)
    is_outlier = jax.random.uniform(k3, (N, 1)) < 0.3
    kp2_rand = jax.random.uniform(k4, (N, 2), jnp.float32, 0.0, 100.0)
    kp2 = jnp.where(is_outlier, kp2_rand, kp2_clean + noise)

    ransac = RansacRigid(inl_th=2.0, batch_size=512, max_iter=4,
                         confidence=0.999, max_lo_iters=5, tile=512)
    model, inliers = ransac(kp1, kp2, k5)
    jax.block_until_ready(model)
    jax.block_until_ready(inliers)
    print("KERNEL_OK")
</pallas_src>

<mosaic_0001>
module attributes {stable_mosaic.version = 11 : i64} {
  func.func @_gen_verify_kernel(%arg0: i32, %arg1: memref<8x512xf32, #tpu.memory_space<vmem>>, %arg2: memref<128x8xf32, #tpu.memory_space<vmem>>, %arg3: memref<1x512xf32, #tpu.memory_space<vmem>>) attributes {dimension_semantics = [#tpu.dimension_semantics<parallel>], iteration_bounds = array<i64: 1>, scalar_prefetch = 0 : i64, scratch_operands = 0 : i64, tpu.core_type = #tpu.core_type<tc>, window_params = [{transform_indices = @transform_0, window_bounds = array<i64: 8, 512>}, {pipeline_mode = #tpu.pipeline_mode<synchronous>, transform_indices = @transform_1, window_bounds = array<i64: 128, 8>}, {transform_indices = @transform_2, window_bounds = array<i64: 1, 512>}]} {
    %c0 = arith.constant 0 : index
    %c0_0 = arith.constant 0 : index
    %0 = vector.load %arg1[%c0, %c0_0] : memref<8x512xf32, #tpu.memory_space<vmem>>, vector<8x512xf32>
    %1 = vector.extract_strided_slice %0 {offsets = [0, 0], sizes = [1, 512], strides = [1, 1]} : vector<8x512xf32> to vector<1x512xf32>
    %2 = vector.extract_strided_slice %0 {offsets = [1, 0], sizes = [1, 512], strides = [1, 1]} : vector<8x512xf32> to vector<1x512xf32>
    %3 = vector.extract_strided_slice %0 {offsets = [2, 0], sizes = [1, 512], strides = [1, 1]} : vector<8x512xf32> to vector<1x512xf32>
    %4 = vector.extract_strided_slice %0 {offsets = [3, 0], sizes = [1, 512], strides = [1, 1]} : vector<8x512xf32> to vector<1x512xf32>
    %5 = vector.extract_strided_slice %0 {offsets = [4, 0], sizes = [1, 512], strides = [1, 1]} : vector<8x512xf32> to vector<1x512xf32>
    %6 = vector.extract_strided_slice %0 {offsets = [5, 0], sizes = [1, 512], strides = [1, 1]} : vector<8x512xf32> to vector<1x512xf32>
    %7 = vector.extract_strided_slice %0 {offsets = [6, 0], sizes = [1, 512], strides = [1, 1]} : vector<8x512xf32> to vector<1x512xf32>
    %8 = vector.extract_strided_slice %0 {offsets = [7, 0], sizes = [1, 512], strides = [1, 1]} : vector<8x512xf32> to vector<1x512xf32>
    %9 = arith.addf %1, %3 : vector<1x512xf32>
    %cst = arith.constant 5.000000e-01 : f32
    %10 = vector.broadcast %cst : f32 to vector<1x512xf32>
    %11 = arith.mulf %10, %9 : vector<1x512xf32>
    %12 = arith.addf %2, %4 : vector<1x512xf32>
    %cst_1 = arith.constant 5.000000e-01 : f32
    %13 = vector.broadcast %cst_1 : f32 to vector<1x512xf32>
    %14 = arith.mulf %13, %12 : vector<1x512xf32>
    %15 = arith.addf %5, %7 : vector<1x512xf32>
    %cst_2 = arith.constant 5.000000e-01 : f32
    %16 = vector.broadcast %cst_2 : f32 to vector<1x512xf32>
    %17 = arith.mulf %16, %15 : vector<1x512xf32>
    %18 = arith.addf %6, %8 : vector<1x512xf32>
    %cst_3 = arith.constant 5.000000e-01 : f32
    %19 = vector.broadcast %cst_3 : f32 to vector<1x512xf32>
    %20 = arith.mulf %19, %18 : vector<1x512xf32>
    %21 = arith.subf %3, %1 : vector<1x512xf32>
    %22 = arith.subf %4, %2 : vector<1x512xf32>
    %23 = arith.subf %7, %5 : vector<1x512xf32>
    %24 = arith.subf %8, %6 : vector<1x512xf32>
    %25 = arith.mulf %21, %23 : vector<1x512xf32>
    %26 = arith.mulf %22, %24 : vector<1x512xf32>
    %27 = arith.addf %25, %26 : vector<1x512xf32>
    %28 = arith.mulf %21, %24 : vector<1x512xf32>
    %29 = arith.mulf %22, %23 : vector<1x512xf32>
    %30 = arith.subf %28, %29 : vector<1x512xf32>
    %31 = arith.mulf %27, %27 : vector<1x512xf32>
    %32 = arith.mulf %30, %30 : vector<1x512xf32>
    %33 = arith.addf %31, %32 : vector<1x512xf32>
    %cst_4 = arith.constant 9.99999996E-13 : f32
    %34 = vector.broadcast %cst_4 : f32 to vector<1x512xf32>
    %35 = arith.cmpf ogt, %33, %34 : vector<1x512xf32>
    %36 = math.rsqrt %33 : vector<1x512xf32>
    %cst_5 = arith.constant 0.000000e+00 : f32
    %37 = vector.broadcast %cst_5 : f32 to vector<1x512xf32>
    %38 = arith.select %35, %36, %37 : vector<1x512xi1>, vector<1x512xf32>
    %39 = arith.mulf %27, %38 : vector<1x512xf32>
    %40 = arith.mulf %30, %38 : vector<1x512xf32>
    %41 = arith.mulf %39, %11 : vector<1x512xf32>
    %42 = arith.mulf %40, %14 : vector<1x512xf32>
    %43 = arith.subf %41, %42 : vector<1x512xf32>
    %44 = arith.subf %17, %43 : vector<1x512xf32>
    %45 = arith.mulf %40, %11 : vector<1x512xf32>
    %46 = arith.mulf %39, %14 : vector<1x512xf32>
    %47 = arith.addf %45, %46 : vector<1x512xf32>
    %48 = arith.subf %20, %47 : vector<1x512xf32>
    %c0_6 = arith.constant 0 : index
    %c0_7 = arith.constant 0 : index
    %49 = vector.load %arg2[%c0_6, %c0_7] : memref<128x8xf32, #tpu.memory_space<vmem>>, vector<128x8xf32>
    %50 = vector.extract_strided_slice %49 {offsets = [0, 0], sizes = [128, 1], strides = [1, 1]} : vector<128x8xf32> to vector<128x1xf32>
    %51 = vector.extract_strided_slice %49 {offsets = [0, 1], sizes = [128, 1], strides = [1, 1]} : vector<128x8xf32> to vector<128x1xf32>
    %52 = vector.extract_strided_slice %49 {offsets = [0, 2], sizes = [128, 1], strides = [1, 1]} : vector<128x8xf32> to vector<128x1xf32>
    %53 = vector.extract_strided_slice %49 {offsets = [0, 3], sizes = [128, 1], strides = [1, 1]} : vector<128x8xf32> to vector<128x1xf32>
    %54 = vector.broadcast %50 : vector<128x1xf32> to vector<128x512xf32>
    %55 = vector.broadcast %39 : vector<1x512xf32> to vector<128x512xf32>
    %56 = arith.mulf %54, %55 : vector<128x512xf32>
    %57 = vector.broadcast %51 : vector<128x1xf32> to vector<128x512xf32>
    %58 = vector.broadcast %40 : vector<1x512xf32> to vector<128x512xf32>
    %59 = arith.mulf %57, %58 : vector<128x512xf32>
    %60 = arith.subf %56, %59 : vector<128x512xf32>
    %61 = vector.broadcast %44 : vector<1x512xf32> to vector<128x512xf32>
    %62 = arith.addf %60, %61 : vector<128x512xf32>
    %63 = vector.broadcast %52 : vector<128x1xf32> to vector<128x512xf32>
    %64 = arith.subf %62, %63 : vector<128x512xf32>
    %65 = vector.broadcast %50 : vector<128x1xf32> to vector<128x512xf32>
    %66 = vector.broadcast %40 : vector<1x512xf32> to vector<128x512xf32>
    %67 = arith.mulf %65, %66 : vector<128x512xf32>
    %68 = vector.broadcast %51 : vector<128x1xf32> to vector<128x512xf32>
    %69 = vector.broadcast %39 : vector<1x512xf32> to vector<128x512xf32>
    %70 = arith.mulf %68, %69 : vector<128x512xf32>
    %71 = arith.addf %67, %70 : vector<128x512xf32>
    %72 = vector.broadcast %48 : vector<1x512xf32> to vector<128x512xf32>
    %73 = arith.addf %71, %72 : vector<128x512xf32>
    %74 = vector.broadcast %53 : vector<128x1xf32> to vector<128x512xf32>
    %75 = arith.subf %73, %74 : vector<128x512xf32>
    %76 = arith.mulf %64, %64 : vector<128x512xf32>
    %77 = arith.mulf %75, %75 : vector<128x512xf32>
    %78 = arith.addf %76, %77 : vector<128x512xf32>
    %cst_8 = arith.constant 1.000000e+00 : f32
    %79 = vector.broadcast %cst_8 : f32 to vector<128x512xf32>
    %80 = arith.cmpf ole, %78, %79 : vector<128x512xf32>
    %81 = arith.extui %80 : vector<128x512xi1> to vector<128x512xi32>
    %82 = arith.sitofp %81 : vector<128x512xi32> to vector<128x512xf32>
    %cst_9 = arith.constant dense<0.000000e+00> : vector<512xf32>
    %83 = vector.multi_reduction <add>, %82, %cst_9 [0] : vector<128x512xf32> to vector<512xf32>
    %84 = vector.shape_cast %83 : vector<512xf32> to vector<1x512xf32>
    %85 = math.absf %39 : vector<1x512xf32>
    %cst_10 = arith.constant 9.99999974E-5 : f32
    %86 = vector.broadcast %cst_10 : f32 to vector<1x512xf32>
    %87 = arith.cmpf ogt, %85, %86 : vector<1x512xf32>
    %cst_11 = arith.constant 1.000000e+00 : f32
    %88 = vector.broadcast %cst_11 : f32 to vector<1x512xf32>
    %cst_12 = arith.constant 0.000000e+00 : f32
    %89 = vector.broadcast %cst_12 : f32 to vector<1x512xf32>
    %90 = arith.subf %89, %88 : vector<1x512xf32>
    %91 = arith.select %87, %84, %90 : vector<1x512xi1>, vector<1x512xf32>
    %c0_13 = arith.constant 0 : index
    %c0_14 = arith.constant 0 : index
    %92 = vector.load %arg3[%c0_13, %c0_14] : memref<1x512xf32, #tpu.memory_space<vmem>>, vector<1x512xf32>
    tpu.vector_store %arg3[%c0_13, %c0_14], %91 {strides = array<i32>} : memref<1x512xf32, #tpu.memory_space<vmem>>, vector<1x512xf32>,
    return
  }
  func.func @transform_0(%arg0: i32) -> (i32, i32) {
    %c0_i32 = arith.constant 0 : i32
    %c0_i32_0 = arith.constant 0 : i32
    return %c0_i32, %arg0 : i32, i32
  }
  func.func @transform_1(%arg0: i32) -> (i32, i32) {
    %c0_i32 = arith.constant 0 : i32
    %c0_i32_0 = arith.constant 0 : i32
    %c0_i32_1 = arith.constant 0 : i32
    return %c0_i32, %c0_i32_0 : i32, i32
  }
  func.func @transform_2(%arg0: i32) -> (i32, i32) {
    %c0_i32 = arith.constant 0 : i32
    %c0_i32_0 = arith.constant 0 : i32
    return %c0_i32, %arg0 : i32, i32
  }
}

</mosaic_0001>

<bundles_post_ra>
// kernel: body.7
= control target key start
LH: loop header
LB: loop body
LE: loop exit
PB: predicated region body
PF: predicated region fallthrough
CT: control target
= control target key end

     0   :  { %v1824_v0 = vmov 0   ;;  %v1825_v17 = vmov 1   ;;  %v1826_v25 = vmov 2   ;;  %v1827_v31 = vmov 3   ;;  %s3548_s1 = inlined_call_operand.vmem [shape: f32[128,8], index: 1, kind: input, shape index: {}]   ;;  %s3549_s0 = inlined_call_operand.vmem [shape: f32[8,512], index: 0, kind: input, shape index: {}]   ;;  %s3550_s2 = inlined_call_operand.vmem [shape: f32[1,512], index: 2, kind: output, shape index: {}]  }
   0x1   :  { %1809 = vset.pattern.permute.xlu1 %v1824_v0  ;;  %1808 = vset.pattern.permute.xlu0 %v1824_v0  ;;  %v1848_v1 = vld [vmem:[%s3548_s1 + $0x10] sm:$0xff]  ;;  %v1853_v2 = vld [vmem:[%s3548_s1] sm:$0xff]  ;;  %v1860_v3 = vld [vmem:[%s3548_s1 + $0x18] sm:$0xff] }
   0x2   :  { %255 = vperm.xlu1 %1809, %v1848_v1   ;;  %245 = vperm.xlu0 %1808, %v1853_v2   ;;  %v1865_v4 = vld [vmem:[%s3548_s1 + $0x8] sm:$0xff]  ;;  %v1877_v6 = vld [vmem:[%s3548_s1 + $0x20] sm:$0xff]  ;;  %v1884_v7 = vld [vmem:[%s3548_s1 + $0x38] sm:$0xff] }
   0x3   :  { %v1872_v5 = vld [vmem:[%s3548_s1 + $0x28] sm:$0xff]  ;;  %v1889_v8 = vld [vmem:[%s3548_s1 + $0x30] sm:$0xff]  ;;  %v1901_v10 = vld [vmem:[%s3548_s1 + $0x40] sm:$0xff] }
   0x4   :  { %v1896_v9 = vld [vmem:[%s3548_s1 + $0x48] sm:$0xff]  ;;  %v1908_v11 = vld [vmem:[%s3548_s1 + $0x58] sm:$0xff]  ;;  %v1913_v12 = vld [vmem:[%s3548_s1 + $0x50] sm:$0xff] }
   0x5   :  { %v1920_v13 = vld [vmem:[%s3548_s1 + $0x68] sm:$0xff]  ;;  %v1925_v14 = vld [vmem:[%s3548_s1 + $0x60] sm:$0xff]  ;;  %v1932_v15 = vld [vmem:[%s3548_s1 + $0x78] sm:$0xff] }
   0x6   :  { %260 = vperm.xlu1 %1809, %v1860_v3   ;;  %250 = vperm.xlu0 %1808, %v1865_v4   ;;  %v1937_v16 = vld [vmem:[%s3548_s1 + $0x70] sm:$0xff]  ;;  %v1958_v18 = vld [vmem:[%s3549_s0] sm:$0xff]  ;;  %v1963_v19 = vld [vmem:[%s3549_s0 + $0x8] sm:$0xff] }
   0x7   :  { %v1970_v20 = vld [vmem:[%s3549_s0 + $0x10] sm:$0xff]  ;;  %v1975_v21 = vld [vmem:[%s3549_s0 + $0x18] sm:$0xff]  ;;  %v35_v22 = vrot.slane %v1958_v18, 6  ;;  %v36_v23 = vrot.slane %v1963_v19, 6 }
   0x8   :  { %v37_v24 = vrot.slane %v1970_v20, 6  ;;  %v38_v26 = vrot.slane %v1975_v21, 6 }
   0x9   :  { %v43_v27 = vsub.f32 %v1958_v18, %v35_v22  ;;  %v44_v28 = vsub.f32 %v1963_v19, %v36_v23 }
   0xa   :  { %270 = vperm.xlu1 %1809, %v1872_v5   ;;  %265 = vperm.xlu0 %1808, %v1877_v6   ;;  %v45_v29 = vsub.f32 %v1970_v20, %v37_v24  ;;  %v46_v30 = vsub.f32 %v1975_v21, %v38_v26 }
   0xb   :  { %v51_v32 = vrot.slane %v43_v27, 4  ;;  %v91_v33 = vrot.slane %v43_v27, 3  ;;  %v52_v34 = vrot.slane %v44_v28, 4  ;;  %v92_v35 = vrot.slane %v44_v28, 3 }
   0xc   :  { %v53_v36 = vrot.slane %v45_v29, 4  ;;  %v93_v37 = vrot.slane %v45_v29, 3  ;;  %v54_v38 = vrot.slane %v46_v30, 4  ;;  %v94_v39 = vrot.slane %v46_v30, 3 }
   0xd   :  { %v59_v40 = vmul.f32 %v51_v32, %v43_v27  ;;  %v79_v41 = vrot.slane %v43_v27, 5  ;;  %v99_v42 = vmul.f32 %v91_v33, %v43_v27  ;;  %v60_v43 = vmul.f32 %v52_v34, %v44_v28 }
   0xe   :  { %280 = vperm.xlu1 %1809, %v1884_v7   ;;  %275 = vperm.xlu0 %1808, %v1889_v8   ;;  %v80_v44 = vrot.slane %v44_v28, 5  ;;  %v100_v45 = vmul.f32 %v92_v35, %v44_v28  ;;  %v61_v46 = vmul.f32 %v53_v36, %v45_v29  ;;  %v81_v47 = vrot.slane %v45_v29, 5 }
   0xf   :  { %v101_v48 = vmul.f32 %v93_v37, %v45_v29  ;;  %v62_v49 = vmul.f32 %v54_v38, %v46_v30  ;;  %v82_v50 = vrot.slane %v46_v30, 5  ;;  %v102_v51 = vmul.f32 %v94_v39, %v46_v30 }
  0x10   :  { %v67_v52 = vrot.slane %v59_v40, 1  ;;  %v87_v53 = vmul.f32 %v79_v41, %v43_v27  ;;  %v107_v54 = vrot.slane %v99_v42, 1  ;;  %v68_v55 = vrot.slane %v60_v43, 1 }
  0x11   :  { %v88_v56 = vmul.f32 %v80_v44, %v44_v28  ;;  %v108_v57 = vrot.slane %v100_v45, 1  ;;  %v69_v58 = vrot.slane %v61_v46, 1  ;;  %v89_v59 = vmul.f32 %v81_v47, %v45_v29 }
  0x12   :  { %290 = vperm.xlu1 %1809, %v1896_v9   ;;  %285 = vperm.xlu0 %1808, %v1901_v10   ;;  %v109_v60 = vrot.slane %v101_v48, 1  ;;  %v70_v61 = vrot.slane %v62_v49, 1  ;;  %v90_v62 = vmul.f32 %v82_v50, %v46_v30  ;;  %v110_v63 = vrot.slane %v102_v51, 1 }
  0x13   :  { %v1995_v0 = vadd.f32 %v67_v52, %v59_v40  ;;  %v19_v36 = vrot.slane %v1958_v18, 2  ;;  %v20_v37 = vrot.slane %v1963_v19, 2  ;;  %v22_v38 = vrot.slane %v1975_v21, 2 }
  0x14   :  { %v2006_v22 = vsub.f32 %v89_v59, %v109_v60  ;;  %v2008_v23 = vadd.f32 %v70_v61, %v62_v49  ;;  %v2010_v24 = vsub.f32 %v90_v62, %v110_v63 }
  0x15   :  { %v28_v39 = vadd.f32 %v20_v37, %v1963_v19 }
  0x16   :  { %300 = vperm.xlu1 %1809, %v1908_v11   ;;  %295 = vperm.xlu0 %1808, %v1913_v12   ;;  %v125_v29 = vmul.f32 %v2006_v22, %v2006_v22  ;;  %v122_v30 = vmul.f32 %v2008_v23, %v2008_v23  ;;  %v126_v32 = vmul.f32 %v2010_v24, %v2010_v24 }
  0x17   :  { %v2050_v44 = vmul.f32 0.5, %v28_v39 }
  0x18   :  { %v130_v35 = vadd.f32 %v126_v32, %v122_v30 }
  0x19   :  { %v156_v49 = vrot.slane %v2050_v44, 6 }
  0x1a   :  { %310 = vperm.xlu1 %1809, %v1920_v13   ;;  %305 = vperm.xlu0 %1808, %v1925_v14   ;;  %vm134_vm3 = vcmp.gt.f32.partialorder %v130_v35, 1e-12 }
  0x1e   :  { %320 = vperm.xlu1 %1809, %v1932_v15   ;;  %315 = vperm.xlu0 %1808, %v1937_v16  }
  0x22   :  { %1811 = vset.pattern.permute.xlu1 %v1825_v17  ;;  %1810 = vset.pattern.permute.xlu0 %v1825_v17  ;;  %v2004_v17 = vadd.f32 %v69_v58, %v61_v46 }
  0x23   :  { %408 = vperm.xlu1 %1811, %v1865_v4   ;;  %404 = vperm.xlu0 %1810, %v1853_v2  }
  0x24   :  { %v121_v28 = vmul.f32 %v2004_v17, %v2004_v17 }
  0x26   :  { %v129_v34 = vadd.f32 %v125_v29, %v121_v28 }
  0x27   :  { %412 = vperm.xlu1 %1811, %v1848_v1   ;;  %416 = vperm.xlu0 %1810, %v1860_v3  }
  0x28   :  { %vm133_vm2 = vcmp.gt.f32.partialorder %v129_v34, 1e-12 }
  0x2b   :  { %420 = vperm.xlu1 %1811, %v1877_v6   ;;  %424 = vperm.xlu0 %1810, %v1872_v5  }
  0x2f   :  { %428 = vperm.xlu1 %1811, %v1889_v8   ;;  %432 = vperm.xlu0 %1810, %v1884_v7  }
  0x33   :  { %436 = vperm.xlu1 %1811, %v1901_v10   ;;  %440 = vperm.xlu0 %1810, %v1896_v9  }
  0x37   :  { %444 = vperm.xlu1 %1811, %v1913_v12   ;;  %448 = vperm.xlu0 %1810, %v1908_v11  }
  0x3b   :  { %452 = vperm.xlu1 %1811, %v1925_v14   ;;  %456 = vperm.xlu0 %1810, %v1920_v13  }
  0x3f   :  { %460 = vperm.xlu1 %1811, %v1937_v16   ;;  %464 = vperm.xlu0 %1810, %v1932_v15  }
  0x43   :  { %1812 = vset.pattern.permute.xlu1 %v1826_v25  ;;  %1813 = vset.pattern.permute.xlu0 %v1826_v25  ;;  %v119_v25 = vmul.f32 %v1995_v0, %v1995_v0 }
  0x44   :  { %692 = vperm.xlu1 %1812, %v1853_v2   ;;  %696 = vperm.xlu0 %1813, %v1865_v4  }
  0x48   :  { %1814 = vset.pattern.permute.xlu1 %v1827_v31  ;;  %700 = vperm.xlu0 %1813, %v1848_v1  }
  0x49   :  { %1092 = vperm.xlu1 %1814, %v1853_v2   ;;  %v1997_v2 = vsub.f32 %v87_v53, %v107_v54  ;;  %v168_v53 = vrot.slane %v2050_v44, 7 }
  0x4c   :  { %704 = vperm.xlu0 %1813, %v1860_v3  }
  0x4d   :  { %1096 = vperm.xlu1 %1814, %v1865_v4   ;;  %v2000_v4 = vadd.f32 %v68_v55, %v60_v43 }
  0x4f   :  { %v120_v26 = vmul.f32 %v2000_v4, %v2000_v4 }
  0x50   :  { %708 = vperm.xlu0 %1813, %v1877_v6  }
  0x51   :  { %1100 = vperm.xlu1 %1814, %v1848_v1   ;;  %v2002_v1 = vsub.f32 %v88_v56, %v108_v57 }
  0x53   :  { %v124_v27 = vmul.f32 %v2002_v1, %v2002_v1 }
  0x54   :  { %712 = vperm.xlu0 %1813, %v1872_v5  }
  0x55   :  { %1104 = vperm.xlu1 %1814, %v1860_v3   ;;  %v123_v3 = vmul.f32 %v1997_v2, %v1997_v2  ;;  %v128_v33 = vadd.f32 %v124_v27, %v120_v26 }
  0x57   :  { %vm132_vm1 = vcmp.gt.f32.partialorder %v128_v33, 1e-12 }
  0x58   :  { %716 = vperm.xlu0 %1813, %v1889_v8  }
  0x59   :  { %1108 = vperm.xlu1 %1814, %v1877_v6   ;;  %v127_v6 = vadd.f32 %v123_v3, %v119_v25 }
  0x5b   :  { %1816 = vrsqrt.f32 %v127_v6  ;;  %vm131_vm0 = vcmp.gt.f32.partialorder %v127_v6, 1e-12 }
  0x5c   :  { %720 = vperm.xlu0 %1813, %v1884_v7   ;;  %1818 = vrsqrt.f32 %v128_v33 }
  0x5d   :  { %1112 = vperm.xlu1 %1814, %v1872_v5   ;;  %1820 = vrsqrt.f32 %v129_v34  ;;  %v21_v5 = vrot.slane %v1970_v20, 2 }
  0x5e   :  { %1822 = vrsqrt.f32 %v130_v35 }
  0x5f   :  { %v29_v40 = vadd.f32 %v21_v5, %v1970_v20 }
  0x60   :  { %724 = vperm.xlu0 %1813, %v1901_v10  }
  0x61   :  { %1116 = vperm.xlu1 %1814, %v1889_v8   ;;  %v27_v8 = vadd.f32 %v19_v36, %v1958_v18  ;;  %v2052_v45 = vmul.f32 0.5, %v29_v40 }
  0x63   :  { %v2048_v43 = vmul.f32 0.5, %v27_v8  ;;  %v157_v50 = vrot.slane %v2052_v45, 6 }
  0x64   :  { %728 = vperm.xlu0 %1813, %v1896_v9  }
  0x65   :  { %1120 = vperm.xlu1 %1814, %v1884_v7   ;;  %v30_v7 = vadd.f32 %v22_v38, %v1975_v21  ;;  %v155_v47 = vrot.slane %v2048_v43, 6  ;;  %v167_v51 = vrot.slane %v2048_v43, 7 }
  0x67   :  { %v2055_v19 = vmul.f32 0.5, %v30_v7 }
  0x68   :  { %732 = vperm.xlu0 %1813, %v1913_v12   ;;  %v1817_v41 = vpop.eup %1816 }
  0x69   :  { %1124 = vperm.xlu1 %1814, %v1901_v10   ;;  %v1819_v42 = vpop.eup %1818  ;;  %v139_v20 = vsel %vm131_vm0, %v1817_v41, 0.0  ;;  %v158_v52 = vrot.slane %v2055_v19, 6  ;;  %v170_v54 = vrot.slane %v2055_v19, 7 }
  0x6a   :  { %v1821_v10 = vpop.eup %1820  ;;  %v140_v21 = vsel %vm132_vm1, %v1819_v42, 0.0  ;;  %v2069_v55 = vmul.f32 %v139_v20, %v1995_v0  ;;  %v2078_v58 = vmul.f32 %v139_v20, %v1997_v2 }
  0x6b   :  { %v1823_v18 = vpop.eup %1822  ;;  %v141_v46 = vsel %vm133_vm2, %v1821_v10, 0.0  ;;  %v2072_v56 = vmul.f32 %v140_v21, %v2000_v4  ;;  %v2084_v60 = vmul.f32 %v140_v21, %v2002_v1 }
  0x6c   :  { %736 = vperm.xlu0 %1813, %v1908_v11   ;;  %v142_v48 = vsel %vm134_vm3, %v1823_v18, 0.0  ;;  %3593 = vst [vmem:[#allocation2_spill] sm:$0xff] %v2069_v55  ;;  %v2075_v57 = vmul.f32 %v141_v46, %v2004_v17  ;;  %v163_v62 = vmul.f32 %v155_v47, %v2069_v55  ;;  %v175_v2 = vmul.f32 %v167_v51, %v2078_v58 }
  0x6d   :  { %1128 = vperm.xlu1 %1814, %v1896_v9   ;;  %v3551_v9 = vlaneseq  ;;  %3594 = vst [vmem:[#allocation3_spill] sm:$0xff] %v2072_v56  ;;  %v2081_v59 = vmul.f32 %v142_v48, %v2008_v23  ;;  %v2090_v61 = vmul.f32 %v142_v48, %v2010_v24  ;;  %v164_v63 = vmul.f32 %v156_v49, %v2072_v56 }
  0x6e   :  { %3595 = vst [vmem:[#allocation4_spill] sm:$0xff] %v2075_v57  ;;  %v165_v0 = vmul.f32 %v157_v50, %v2075_v57  ;;  %v176_v1 = vmul.f32 %v168_v53, %v2084_v60  ;;  %v199_v23 = vmul.f32 %v155_v47, %v2078_v58  ;;  %v200_v24 = vmul.f32 %v156_v49, %v2084_v60 }
  0x6f   :  { %3596 = vst [vmem:[#allocation5_spill] sm:$0xff] %v2081_v59  ;;  %v166_v4 = vmul.f32 %v158_v52, %v2081_v59  ;;  %v203_v25 = vmul.f32 %v167_v51, %v2069_v55  ;;  %v204_v3 = vmul.f32 %v168_v53, %v2072_v56  ;;  %v202_v27 = vmul.f32 %v158_v52, %v2090_v61 }
  0x70   :  { %740 = vperm.xlu0 %1813, %v1925_v14   ;;  %v206_v29 = vmul.f32 %v170_v54, %v2081_v59  ;;  %v179_v30 = vsub.f32 %v163_v62, %v175_v2  ;;  %v2117_v37 = vshrl.u32 %v3551_v9, 7 }
  0x71   :  { %1132 = vperm.xlu1 %1814, %v1913_v12   ;;  %v169_v12 = vrot.slane %v2052_v45, 7  ;;  %v207_v35 = vadd.f32 %v203_v25, %v199_v23  ;;  %v208_v36 = vadd.f32 %v204_v3, %v200_v24 }
  0x72   :  { %3597 = vst [vmem:[#allocation6_spill] sm:$0xff] %v2117_v37  ;;  %v210_v38 = vadd.f32 %v206_v29, %v202_v27  ;;  %v187_v8 = vrot.slane %v179_v30, 6  ;;  %v325_v18 = vsub.s32 2, %v2117_v37  ;;  %v1013_v48 = vsub.s32 5, %v2117_v37 }
  0x73   :  { %v205_v28 = vmul.f32 %v169_v12, %v2075_v57  ;;  %v215_v42 = vrot.slane %v207_v35, 5  ;;  %v216_v10 = vrot.slane %v208_v36, 5 }
  0x74   :  { %744 = vperm.xlu0 %1813, %v1920_v13   ;;  %v218_v21 = vrot.slane %v210_v38, 5  ;;  %v195_v47 = vsub.f32 %v2048_v43, %v187_v8 }
  0x75   :  { %1136 = vperm.xlu1 %1814, %v1908_v11   ;;  %v2087_v11 = vmul.f32 %v141_v46, %v2006_v22  ;;  %v178_v22 = vmul.f32 %v170_v54, %v2090_v61  ;;  %v613_v46 = vsub.s32 4, %v2117_v37  ;;  %v223_v52 = vsub.f32 %v2048_v43, %v215_v42 }
  0x76   :  { %v224_v53 = vsub.f32 %v2050_v44, %v216_v10  ;;  %v2143_v54 = vrot.slane %v2072_v56, %v325_v18  ;;  %v2154_v43 = vrot.slane %v2078_v58, %v325_v18 }
  0x77   :  { %v177_v17 = vmul.f32 %v169_v12, %v2087_v11  ;;  %v201_v26 = vmul.f32 %v157_v50, %v2087_v11  ;;  %v182_v34 = vsub.f32 %v166_v4, %v178_v22  ;;  %v2140_v12 = vrot.slane %v2069_v55, %v325_v18 }
  0x78   :  { %748 = vperm.xlu0 %1813, %v1937_v16   ;;  %3598 = vst [vmem:[#allocation7_spill] sm:$0xff] %v2143_v54  ;;  %3600 = vst [vmem:[#allocation9_spill] sm:$0xff] %v2154_v43  ;;  %v2160_v2 = vrot.slane %v2087_v11, %v325_v18  ;;  %v2163_v4 = vrot.slane %v2090_v61, %v325_v18  ;;  %v2179_v23 = vrot.slane %v224_v53, %v1013_v48 }
  0x79   :  { %1140 = vperm.xlu1 %1814, %v1925_v14   ;;  %v180_v14 = vsub.f32 %v164_v63, %v176_v1  ;;  %v181_v33 = vsub.f32 %v165_v0, %v177_v17  ;;  %v209_v5 = vadd.f32 %v205_v28, %v201_v26  ;;  %v190_v41 = vrot.slane %v182_v34, 6 }
  0x7a   :  { %v2148_v63 = vrot.slane %v2075_v57, %v325_v18  ;;  %v2151_v0 = vrot.slane %v2081_v59, %v325_v18  ;;  %3601 = vst [vmem:[#allocation10_spill] sm:$0xff] %v2163_v4 }
  0x7b   :  { %v188_v39 = vrot.slane %v180_v14, 6  ;;  %v189_v7 = vrot.slane %v181_v33, 6  ;;  %v217_v20 = vrot.slane %v209_v5, 5  ;;  %v198_v51 = vsub.f32 %v2055_v19, %v190_v41 }
  0x7c   :  { %752 = vperm.xlu0 %1813, %v1932_v15   ;;  %3599 = vst [vmem:[#allocation8_spill] sm:$0xff] %v2148_v63 }
  0x7d   :  { %v2111_v32 = vpop.permute.xlu1 %255  ;;  %1144 = vperm.xlu1 %1814, %v1920_v13   ;;  %v2114_v6 = vpop.permute.xlu0 %245  ;;  %v197_v50 = vsub.f32 %v2052_v45, %v189_v7  ;;  %v225_v62 = vsub.f32 %v2052_v45, %v217_v20  ;;  %v2165_v45 = vrot.slane %v195_v47, %v613_v46  ;;  %v2175_v58 = vrot.slane %v198_v51, %v613_v46 }
  0x7e   :  { %v2183_v11 = vmul.f32 %v2140_v12, %v2114_v6  ;;  %v2191_v25 = vmul.f32 %v2143_v54, %v2114_v6  ;;  %v2195_v3 = vmul.f32 %v2148_v63, %v2114_v6  ;;  %v2199_v26 = vmul.f32 %v2151_v0, %v2114_v6 }
  0x7f   :  { %v2173_v22 = vrot.slane %v197_v50, %v613_v46  ;;  %3604 = vst [vmem:[#allocation13_spill] sm:$0xff] %v2175_v58  ;;  %v2185_v61 = vrot.slane %v225_v62, %v1013_v48  ;;  %v2203_v27 = vmul.f32 %v2140_v12, %v2111_v32  ;;  %v2207_v28 = vmul.f32 %v2143_v54, %v2111_v32 }
  0x80   :  { %1815 = vset.pattern.permute.xlu0 %v1827_v31  ;;  %v196_v31 = vsub.f32 %v2050_v44, %v188_v39  ;;  %v2157_v44 = vrot.slane %v2084_v60, %v325_v18  ;;  %v2177_v60 = vrot.slane %v223_v52, %v1013_v48  ;;  %v2211_v29 = vmul.f32 %v2148_v63, %v2111_v32 }
  0x81   :  { %v2120_v40 = vpop.permute.xlu1 %260  ;;  %1148 = vperm.xlu1 %1814, %v1937_v16   ;;  %v2123_v13 = vpop.permute.xlu0 %250  ;;  %3603 = vst [vmem:[#allocation12_spill] sm:$0xff] %v2173_v22  ;;  %v2215_v30 = vmul.f32 %v2151_v0, %v2111_v32  ;;  %v2219_v14 = vmul.f32 %v2154_v43, %v2114_v6  ;;  %v2231_v36 = vmul.f32 %v2160_v2, %v2114_v6 }
  0x82   :  { %v2227_v35 = vmul.f32 %v2157_v44, %v2114_v6  ;;  %v2235_v5 = vmul.f32 %v2163_v4, %v2114_v6  ;;  %v2239_v38 = vmul.f32 %v2154_v43, %v2111_v32  ;;  %v2243_v8 = vmul.f32 %v2140_v12, %v2123_v13 }
  0x83   :  { %v2247_v39 = vmul.f32 %v2157_v44, %v2111_v32  ;;  %v2251_v7 = vmul.f32 %v2160_v2, %v2111_v32  ;;  %v2255_v6 = vmul.f32 %v2163_v4, %v2111_v32  ;;  %v2259_v41 = vmul.f32 %v2143_v54, %v2123_v13 }
  0x84   :  { %3605 = vst [vmem:[#allocation14_spill] sm:$0xff] %v2239_v38  ;;  %v2263_v42 = vmul.f32 %v2148_v63, %v2123_v13  ;;  %v2267_v10 = vmul.f32 %v2151_v0, %v2123_v13  ;;  %v2271_v18 = vmul.f32 %v2140_v12, %v2120_v40  ;;  %v2275_v32 = vmul.f32 %v2143_v54, %v2120_v40 }
  0x85   :  { %v2130_v49 = vpop.permute.xlu1 %270  ;;  %1152 = vperm.xlu1 %1814, %v1932_v15   ;;  %v2133_v16 = vpop.permute.xlu0 %265  ;;  %v226_v15 = vsub.f32 %v2055_v19, %v218_v21  ;;  %v2167_v19 = vrot.slane %v196_v31, %v613_v46  ;;  %3606 = vst [vmem:[#allocation15_spill] sm:$0xff] %v2247_v39  ;;  %3607 = vst [vmem:[#allocation16_spill] sm:$0xff] %v2251_v7  ;;  %v2279_v20 = vmul.f32 %v2148_v63, %v2120_v40 }
  0x86   :  { %3608 = vst [vmem:[#allocation17_spill] sm:$0xff] %v2255_v6  ;;  %v2283_v21 = vmul.f32 %v2151_v0, %v2120_v40  ;;  %v2287_v46 = vmul.f32 %v2154_v43, %v2123_v13  ;;  %v2299_v50 = vmul.f32 %v2160_v2, %v2123_v13  ;;  %v2303_v51 = vmul.f32 %v2163_v4, %v2123_v13 }
  0x87   :  { %3602 = vst [vmem:[#allocation11_spill] sm:$0xff] %v2167_v19  ;;  %v2187_v24 = vrot.slane %v226_v15, %v1013_v48  ;;  %v2295_v48 = vmul.f32 %v2157_v44, %v2123_v13  ;;  %v2307_v52 = vmul.f32 %v2154_v43, %v2120_v40  ;;  %v2311_v53 = vmul.f32 %v2140_v12, %v2133_v16 }
  0x88   :  { %v2315_v62 = vmul.f32 %v2157_v44, %v2120_v40  ;;  %v2319_v15 = vmul.f32 %v2160_v2, %v2120_v40  ;;  %v2323_v13 = vmul.f32 %v2163_v4, %v2120_v40  ;;  %v2327_v9 = vmul.f32 %v2143_v54, %v2133_v16 }
  0x89   :  { %v2169_v1 = vpop.permute.xlu1 %280  ;;  %v2171_v17 = vpop.permute.xlu0 %275  ;;  %3609 = vst [vmem:[#allocation18_spill] sm:$0xff] %v2307_v52  ;;  %v2331_v37 = vmul.f32 %v2148_v63, %v2133_v16  ;;  %v2335_v59 = vmul.f32 %v2151_v0, %v2133_v16  ;;  %v2339_v57 = vmul.f32 %v2140_v12, %v2130_v49  ;;  %v2343_v40 = vmul.f32 %v2143_v54, %v2130_v49 }
  0x8a   :  { %3610 = vst [vmem:[#allocation19_spill] sm:$0xff] %v2315_v62  ;;  %3611 = vst [vmem:[#allocation20_spill] sm:$0xff] %v2319_v15  ;;  %v2347_v56 = vmul.f32 %v2148_v63, %v2130_v49  ;;  %v2351_v55 = vmul.f32 %v2151_v0, %v2130_v49  ;;  %v2363_v52 = vmul.f32 %v2157_v44, %v2133_v16 }
  0x8b   :  { %3612 = vst [vmem:[#allocation21_spill] sm:$0xff] %v2323_v13  ;;  %3613 = vst [vmem:[#allocation22_spill] sm:$0xff] %v2327_v9  ;;  %v2355_v13 = vmul.f32 %v2154_v43, %v2133_v16 }
  0x8c   :  { %3614 = vst [vmem:[#allocation23_spill] sm:$0xff] %v2331_v37  ;;  %3615 = vst [vmem:[#allocation24_spill] sm:$0xff] %v2335_v59 }
  0x8d   :  { %v2221_v33 = vpop.permute.xlu1 %290  ;;  %v2223_v34 = vpop.permute.xlu0 %285  ;;  %3616 = vst [vmem:[#allocation25_spill] sm:$0xff] %v2339_v57  ;;  %3617 = vst [vmem:[#allocation26_spill] sm:$0xff] %v2343_v40  ;;  %v2367_v40 = vmul.f32 %v2160_v2, %v2133_v16  ;;  %v2383_v57 = vmul.f32 %v2157_v44, %v2130_v49 }
  0x8e   :  { %3618 = vst [vmem:[#allocation27_spill] sm:$0xff] %v2347_v56  ;;  %3619 = vst [vmem:[#allocation28_spill] sm:$0xff] %v2351_v55  ;;  %v2371_v56 = vmul.f32 %v2163_v4, %v2133_v16  ;;  %v2375_v55 = vmul.f32 %v2154_v43, %v2130_v49  ;;  %v2391_v16 = vmul.f32 %v2163_v4, %v2130_v49 }
  0x8f   :  { %3620 = vst [vmem:[#allocation29_spill] sm:$0xff] %v2355_v13  ;;  %3623 = vst [vmem:[#allocation32_spill] sm:$0xff] %v2363_v52  ;;  %v2379_v13 = vmul.f32 %v2140_v12, %v2171_v17  ;;  %v2387_v52 = vmul.f32 %v2160_v2, %v2130_v49  ;;  %v2411_v49 = vmul.f32 %v2143_v54, %v2169_v1 }
  0x90   :  { %3624 = vst [vmem:[#allocation33_spill] sm:$0xff] %v2367_v40  ;;  %3625 = vst [vmem:[#allocation34_spill] sm:$0xff] %v2371_v56  ;;  %v2395_v56 = vmul.f32 %v2143_v54, %v2171_v17  ;;  %v2403_v40 = vmul.f32 %v2151_v0, %v2171_v17 }
  0x91   :  { %v2289_v47 = vpop.permute.xlu1 %300  ;;  %v2291_v31 = vpop.permute.xlu0 %295  ;;  %3626 = vst [vmem:[#allocation35_spill] sm:$0xff] %v2375_v55  ;;  %3627 = vst [vmem:[#allocation36_spill] sm:$0xff] %v2379_v13  ;;  %v2399_v55 = vmul.f32 %v2148_v63, %v2171_v17 }
  0x92   :  { %3628 = vst [vmem:[#allocation37_spill] sm:$0xff] %v2383_v57  ;;  %3629 = vst [vmem:[#allocation38_spill] sm:$0xff] %v2387_v52  ;;  %v2407_v57 = vmul.f32 %v2140_v12, %v2169_v1  ;;  %v2419_v52 = vmul.f32 %v2151_v0, %v2169_v1  ;;  %v2581_v13 = vmul.f32 %v2160_v2, %v2291_v31 }
  0x93   :  { %3630 = vst [vmem:[#allocation39_spill] sm:$0xff] %v2391_v16  ;;  %3631 = vst [vmem:[#allocation40_spill] sm:$0xff] %v2395_v56  ;;  %v2415_v16 = vmul.f32 %v2148_v63, %v2169_v1  ;;  %v2585_v6 = vmul.f32 %v2163_v4, %v2291_v31 }
  0x94   :  { %3632 = vst [vmem:[#allocation41_spill] sm:$0xff] %v2399_v55  ;;  %3633 = vst [vmem:[#allocation42_spill] sm:$0xff] %v2403_v40  ;;  %v2423_v55 = vmul.f32 %v2154_v43, %v2171_v17 }
  0x95   :  { %v2357_v15 = vpop.permute.xlu1 %310  ;;  %v2359_v62 = vpop.permute.xlu0 %305  ;;  %3634 = vst [vmem:[#allocation43_spill] sm:$0xff] %v2407_v57  ;;  %3635 = vst [vmem:[#allocation44_spill] sm:$0xff] %v2411_v49  ;;  %v2431_v57 = vmul.f32 %v2157_v44, %v2171_v17  ;;  %v2435_v49 = vmul.f32 %v2160_v2, %v2171_v17 }
  0x96   :  { %3621 = vst [vmem:[#allocation30_spill] sm:$0xff] %v2357_v15  ;;  %3622 = vst [vmem:[#allocation31_spill] sm:$0xff] %v2359_v62 }
  0x97   :  { %3636 = vst [vmem:[#allocation45_spill] sm:$0xff] %v2415_v16  ;;  %3637 = vst [vmem:[#allocation46_spill] sm:$0xff] %v2419_v52  ;;  %v2439_v16 = vmul.f32 %v2163_v4, %v2171_v17  ;;  %v2443_v52 = vmul.f32 %v2154_v43, %v2169_v1  ;;  %v2459_v17 = vmul.f32 %v2163_v4, %v2169_v1 }
  0x98   :  { %3638 = vst [vmem:[#allocation47_spill] sm:$0xff] %v2423_v55  ;;  %3641 = vst [vmem:[#allocation50_spill] sm:$0xff] %v2431_v57  ;;  %v2455_v57 = vmul.f32 %v2160_v2, %v2169_v1 }
  0x99   :  { %v2425_v40 = vpop.permute.xlu1 %320  ;;  %v2427_v56 = vpop.permute.xlu0 %315  ;;  %3642 = vst [vmem:[#allocation51_spill] sm:$0xff] %v2435_v49  ;;  %3643 = vst [vmem:[#allocation52_spill] sm:$0xff] %v2439_v16  ;;  %v2463_v16 = vmul.f32 %v2143_v54, %v2223_v34 }
  0x9a   :  { %3639 = vst [vmem:[#allocation48_spill] sm:$0xff] %v2425_v40  ;;  %3640 = vst [vmem:[#allocation49_spill] sm:$0xff] %v2427_v56  ;;  %v2447_v40 = vmul.f32 %v2140_v12, %v2223_v34  ;;  %v2451_v56 = vmul.f32 %v2157_v44, %v2169_v1  ;;  %v2479_v1 = vmul.f32 %v2143_v54, %v2221_v33 }
  0x9b   :  { %3644 = vst [vmem:[#allocation53_spill] sm:$0xff] %v2443_v52  ;;  %3647 = vst [vmem:[#allocation56_spill] sm:$0xff] %v2455_v57  ;;  %v2467_v52 = vmul.f32 %v2148_v63, %v2223_v34  ;;  %v2487_v57 = vmul.f32 %v2151_v0, %v2221_v33 }
  0x9c   :  { %3645 = vst [vmem:[#allocation54_spill] sm:$0xff] %v2447_v40  ;;  %3646 = vst [vmem:[#allocation55_spill] sm:$0xff] %v2451_v56  ;;  %v2471_v40 = vmul.f32 %v2151_v0, %v2223_v34  ;;  %v2475_v56 = vmul.f32 %v2140_v12, %v2221_v33 }
  0x9d   :  { %3648 = vst [vmem:[#allocation57_spill] sm:$0xff] %v2459_v17  ;;  %3649 = vst [vmem:[#allocation58_spill] sm:$0xff] %v2463_v16  ;;  %v2483_v17 = vmul.f32 %v2148_v63, %v2221_v33 }
  0x9e   :  { %3650 = vst [vmem:[#allocation59_spill] sm:$0xff] %v2467_v52  ;;  %3651 = vst [vmem:[#allocation60_spill] sm:$0xff] %v2471_v40  ;;  %v2491_v52 = vmul.f32 %v2154_v43, %v2223_v34  ;;  %v2495_v40 = vmul.f32 %v2157_v44, %v2223_v34  ;;  %v2511_v16 = vpop.permute.xlu0 %404 }
  0x9f   :  { %3652 = vst [vmem:[#allocation61_spill] sm:$0xff] %v2475_v56  ;;  %3653 = vst [vmem:[#allocation62_spill] sm:$0xff] %v2479_v1  ;;  %v2499_v56 = vmul.f32 %v2160_v2, %v2223_v34  ;;  %v2503_v1 = vmul.f32 %v2163_v4, %v2223_v34  ;;  %v2523_v34 = vmul.f32 %v2160_v2, %v2221_v33 }
  0xa0   :  { %3654 = vst [vmem:[#allocation63_spill] sm:$0xff] %v2483_v17  ;;  %3655 = vst [vmem:[#allocation64_spill] sm:$0xff] %v2487_v57  ;;  %v2507_v17 = vmul.f32 %v2154_v43, %v2221_v33  ;;  %v2509_v57 = vpop.permute.xlu1 %408 }
  0xa1   :  { %3656 = vst [vmem:[#allocation65_spill] sm:$0xff] %v2491_v52  ;;  %3657 = vst [vmem:[#allocation66_spill] sm:$0xff] %v2495_v40  ;;  %v2515_v52 = vmul.f32 %v2140_v12, %v2291_v31  ;;  %v2519_v40 = vmul.f32 %v2157_v44, %v2221_v33  ;;  %v488_v7 = vmul.f32 %v2157_v44, %v2509_v57 }
  0xa2   :  { %3658 = vst [vmem:[#allocation67_spill] sm:$0xff] %v2499_v56  ;;  %3659 = vst [vmem:[#allocation68_spill] sm:$0xff] %v2503_v1  ;;  %v2527_v1 = vmul.f32 %v2163_v4, %v2221_v33  ;;  %v2535_v56 = vmul.f32 %v2148_v63, %v2291_v31  ;;  %v483_v33 = vmul.f32 %v2154_v43, %v2511_v16  ;;  %v2569_v55 = vpop.permute.xlu0 %416 }
  0xa3   :  { %3660 = vst [vmem:[#allocation69_spill] sm:$0xff] %v2507_v17  ;;  %3661 = vst [vmem:[#allocation70_spill] sm:$0xff] %v2515_v52  ;;  %v2531_v17 = vmul.f32 %v2143_v54, %v2291_v31  ;;  %v2539_v52 = vmul.f32 %v2151_v0, %v2291_v31  ;;  %v489_v39 = vmul.f32 %v2160_v2, %v2509_v57 }
  0xa4   :  { %3662 = vst [vmem:[#allocation71_spill] sm:$0xff] %v2519_v40  ;;  %3663 = vst [vmem:[#allocation72_spill] sm:$0xff] %v2523_v34  ;;  %v2543_v40 = vmul.f32 %v2140_v12, %v2289_v47  ;;  %v2553_v34 = vmul.f32 %v2148_v63, %v2289_v47  ;;  %v2567_v49 = vpop.permute.xlu1 %412  ;;  %v547_v38 = vsub.f32 %v2183_v11, %v483_v33 }
  0xa5   :  { %3664 = vst [vmem:[#allocation73_spill] sm:$0xff] %v2527_v1  ;;  %3665 = vst [vmem:[#allocation74_spill] sm:$0xff] %v2531_v17  ;;  %v2549_v1 = vmul.f32 %v2143_v54, %v2289_v47  ;;  %v486_v17 = vmul.f32 %v2163_v4, %v2511_v16 }
  0xa6   :  { %3666 = vst [vmem:[#allocation75_spill] sm:$0xff] %v2535_v56  ;;  %3667 = vst [vmem:[#allocation76_spill] sm:$0xff] %v2539_v52  ;;  %v2557_v56 = vmul.f32 %v2151_v0, %v2289_v47  ;;  %v484_v52 = vmul.f32 %v2157_v44, %v2511_v16  ;;  %v2616_v9 = vpop.permute.xlu0 %424 }
  0xa7   :  { %3668 = vst [vmem:[#allocation77_spill] sm:$0xff] %v2543_v40  ;;  %3669 = vst [vmem:[#allocation78_spill] sm:$0xff] %v2549_v1  ;;  %v485_v40 = vmul.f32 %v2160_v2, %v2511_v16  ;;  %v487_v1 = vmul.f32 %v2154_v43, %v2509_v57 }
  0xa8   :  { %3670 = vst [vmem:[#allocation79_spill] sm:$0xff] %v2553_v34  ;;  %3671 = vst [vmem:[#allocation80_spill] sm:$0xff] %v2557_v56  ;;  %v2573_v34 = vmul.f32 %v2154_v43, %v2291_v31  ;;  %v2577_v56 = vmul.f32 %v2157_v44, %v2291_v31  ;;  %v2604_v31 = vmul.f32 %v2148_v63, %v2359_v62  ;;  %v2614_v33 = vpop.permute.xlu1 %420 }
  0xa9   :  { %3674 = vst [vmem:[#allocation83_spill] sm:$0xff] %v2581_v13  ;;  %3675 = vst [vmem:[#allocation84_spill] sm:$0xff] %v2585_v6  ;;  %v2600_v13 = vmul.f32 %v2143_v54, %v2359_v62  ;;  %v2608_v6 = vmul.f32 %v2151_v0, %v2359_v62  ;;  %v548_v59 = vsub.f32 %v2191_v25, %v484_v52 }
  0xaa   :  { %3672 = vst [vmem:[#allocation81_spill] sm:$0xff] %v2573_v34  ;;  %3673 = vst [vmem:[#allocation82_spill] sm:$0xff] %v2577_v56  ;;  %v490_v34 = vmul.f32 %v2163_v4, %v2509_v57  ;;  %v2595_v56 = vmul.f32 %v2140_v12, %v2359_v62  ;;  %v549_v37 = vsub.f32 %v2195_v3, %v485_v40 }
  0xab   :  { %3677 = vst [vmem:[#allocation86_spill] sm:$0xff] %v2600_v13  ;;  %3678 = vst [vmem:[#allocation87_spill] sm:$0xff] %v2604_v31  ;;  %v551_v11 = vsub.f32 %v2243_v8, %v487_v1  ;;  %v2620_v13 = vmul.f32 %v2154_v43, %v2289_v47  ;;  %v2624_v62 = vmul.f32 %v2157_v44, %v2289_v47 }
  0xac   :  { %3676 = vst [vmem:[#allocation85_spill] sm:$0xff] %v2595_v56  ;;  %3679 = vst [vmem:[#allocation88_spill] sm:$0xff] %v2608_v6  ;;  %v550_v56 = vsub.f32 %v2199_v26, %v486_v17  ;;  %v2628_v25 = vmul.f32 %v2160_v2, %v2289_v47  ;;  %v2632_v3 = vmul.f32 %v2163_v4, %v2289_v47 }
  0xad   :  { %3680 = vst [vmem:[#allocation89_spill] sm:$0xff] %v2616_v9  ;;  %3681 = vst [vmem:[#allocation90_spill] sm:$0xff] %v2620_v13  ;;  %v552_v26 = vsub.f32 %v2259_v41, %v488_v7  ;;  %v553_v8 = vsub.f32 %v2263_v42, %v489_v39  ;;  %v554_v52 = vsub.f32 %v2267_v10, %v490_v34  ;;  %v2668_v10 = vpop.permute.xlu1 %428  ;;  %v2670_v34 = vpop.permute.xlu0 %432 }
  0xae   :  { %3682 = vst [vmem:[#allocation91_spill] sm:$0xff] %v2624_v62  ;;  %3683 = vst [vmem:[#allocation92_spill] sm:$0xff] %v2628_v25  ;;  %v2639_v40 = vmul.f32 %v2140_v12, %v2357_v15  ;;  %v2642_v17 = vadd.f32 %v2165_v45, %v547_v38  ;;  %v2646_v1 = vmul.f32 %v2143_v54, %v2357_v15 }
  0xaf   :  { %3684 = vst [vmem:[#allocation93_spill] sm:$0xff] %v2632_v3  ;;  %v2650_v47 = vmul.f32 %v2148_v63, %v2357_v15  ;;  %v2654_v39 = vmul.f32 %v2151_v0, %v2357_v15  ;;  %v2657_v7 = vadd.f32 %v2167_v19, %v548_v59  ;;  %v2660_v41 = vadd.f32 %v2173_v22, %v549_v37 }
  0xb0   :  { %3685 = vst [vmem:[#allocation94_spill] sm:$0xff] %v2639_v40  ;;  %3686 = vst [vmem:[#allocation95_spill] sm:$0xff] %v2646_v1  ;;  %v2663_v38 = vadd.f32 %v2175_v58, %v550_v56  ;;  %v2666_v42 = vadd.f32 %v2165_v45, %v551_v11  ;;  %v491_v15 = vmul.f32 %v2154_v43, %v2567_v49 }
  0xb1   :  { %3687 = vst [vmem:[#allocation96_spill] sm:$0xff] %v2650_v47  ;;  %3688 = vst [vmem:[#allocation97_spill] sm:$0xff] %v2654_v39  ;;  %v492_v59 = vmul.f32 %v2157_v44, %v2567_v49  ;;  %v493_v37 = vmul.f32 %v2160_v2, %v2567_v49  ;;  %v494_v56 = vmul.f32 %v2163_v4, %v2567_v49  ;;  %v2707_v6 = vpop.permute.xlu1 %436  ;;  %v2709_v31 = vpop.permute.xlu0 %440 }
  0xb2   :  { %3689 = vst [vmem:[#allocation98_spill] sm:$0xff] %v2666_v42  ;;  %3690 = vst [vmem:[#allocation99_spill] sm:$0xff] %v2668_v10  ;;  %v2681_v39 = vadd.f32 %v2167_v19, %v552_v26  ;;  %v2684_v11 = vadd.f32 %v2173_v22, %v553_v8  ;;  %v2687_v47 = vadd.f32 %v2175_v58, %v554_v52 }
  0xb3   :  { %3691 = vst [vmem:[#allocation100_spill] sm:$0xff] %v2670_v34  ;;  %v883_v1 = vmul.f32 %v2511_v16, %v2140_v12  ;;  %v884_v3 = vmul.f32 %v2511_v16, %v2143_v54  ;;  %v885_v25 = vmul.f32 %v2511_v16, %v2148_v63  ;;  %v886_v62 = vmul.f32 %v2511_v16, %v2151_v0 }
  0xb4   :  { %3692 = vst [vmem:[#allocation101_spill] sm:$0xff] %v2681_v39  ;;  %3693 = vst [vmem:[#allocation102_spill] sm:$0xff] %v2684_v11  ;;  %v495_v26 = vmul.f32 %v2154_v43, %v2569_v55  ;;  %v496_v8 = vmul.f32 %v2157_v44, %v2569_v55  ;;  %v497_v52 = vmul.f32 %v2160_v2, %v2569_v55 }
  0xb5   :  { %3694 = vst [vmem:[#allocation103_spill] sm:$0xff] %v2687_v47  ;;  %v498_v13 = vmul.f32 %v2163_v4, %v2569_v55  ;;  %v887_v40 = vmul.f32 %v2509_v57, %v2140_v12  ;;  %3695 = vst [vmem:[#allocation104_spill] sm:$0xff] %v2707_v6  ;;  %v555_v16 = vsub.f32 %v2203_v27, %v491_v15 }
  0xb6   :  { %3696 = vst [vmem:[#allocation105_spill] sm:$0xff] %v2709_v31  ;;  %v556_v34 = vsub.f32 %v2207_v28, %v492_v59  ;;  %v557_v47 = vsub.f32 %v2211_v29, %v493_v37  ;;  %v558_v11 = vsub.f32 %v2215_v30, %v494_v56  ;;  %v947_v39 = vadd.f32 %v883_v1, %v2219_v14  ;;  %v2730_v59 = vpop.permute.xlu1 %444  ;;  %v2732_v37 = vpop.permute.xlu0 %448 }
  0xb7   :  { %v888_v42 = vmul.f32 %v2509_v57, %v2143_v54  ;;  %v889_v10 = vmul.f32 %v2509_v57, %v2148_v63  ;;  %v890_v6 = vmul.f32 %v2509_v57, %v2151_v0  ;;  %v948_v31 = vadd.f32 %v884_v3, %v2227_v35  ;;  %3697 = vst [vmem:[#allocation106_spill] sm:$0xff] %v2730_v59 }
  0xb8   :  { %v949_v27 = vadd.f32 %v885_v25, %v2231_v36  ;;  %v950_v28 = vadd.f32 %v886_v62, %v2235_v5  ;;  %v559_v29 = vsub.f32 %v2271_v18, %v495_v26  ;;  %v560_v30 = vsub.f32 %v2275_v32, %v496_v8  ;;  %3698 = vst [vmem:[#allocation107_spill] sm:$0xff] %v2732_v37  ;;  %v3711_v37 = vld [vmem:[#allocation14_spill] sm:$0xff] }
  0xb9   :  { %v561_v14 = vsub.f32 %v2279_v20, %v497_v52  ;;  %v562_v15 = vsub.f32 %v2283_v21, %v498_v13  ;;  %v951_v1 = vadd.f32 %v887_v40, %v2287_v46  ;;  %v2735_v57 = vadd.f32 %v2165_v45, %v555_v16 }
  0xba   :  { %v2738_v35 = vadd.f32 %v2167_v19, %v556_v34  ;;  %v2741_v36 = vadd.f32 %v2173_v22, %v557_v47  ;;  %v2744_v5 = vadd.f32 %v2175_v58, %v558_v11  ;;  %v2747_v18 = vadd.f32 %v2177_v60, %v947_v39 }
  0xbb   :  { %v952_v32 = vadd.f32 %v888_v42, %v2295_v48  ;;  %v953_v20 = vadd.f32 %v889_v10, %v2299_v50  ;;  %v954_v21 = vadd.f32 %v890_v6, %v2303_v51  ;;  %v2753_v46 = vadd.f32 %v2179_v23, %v948_v31  ;;  %v2776_v51 = vpop.permute.xlu1 %452  ;;  %v2778_v31 = vpop.permute.xlu0 %456 }
  0xbc   :  { %v2756_v62 = vadd.f32 %v2185_v61, %v949_v27  ;;  %v2759_v13 = vadd.f32 %v2187_v24, %v950_v28  ;;  %v2762_v25 = vadd.f32 %v2165_v45, %v559_v29  ;;  %v2765_v3 = vadd.f32 %v2167_v19, %v560_v30  ;;  %3703 = vst [vmem:[#allocation112_spill] sm:$0xff] %v2776_v51 }
  0xbd   :  { %v2768_v48 = vadd.f32 %v2173_v22, %v561_v14  ;;  %v2771_v6 = vadd.f32 %v2175_v58, %v562_v15  ;;  %v2774_v50 = vadd.f32 %v2177_v60, %v951_v1  ;;  %3704 = vst [vmem:[#allocation113_spill] sm:$0xff] %v2778_v31  ;;  %v499_v40 = vmul.f32 %v2154_v43, %v2614_v33 }
  0xbe   :  { %3699 = vst [vmem:[#allocation108_spill] sm:$0xff] %v2762_v25  ;;  %3700 = vst [vmem:[#allocation109_spill] sm:$0xff] %v2765_v3  ;;  %v500_v47 = vmul.f32 %v2157_v44, %v2614_v33  ;;  %v501_v39 = vmul.f32 %v2160_v2, %v2614_v33  ;;  %v502_v42 = vmul.f32 %v2163_v4, %v2614_v33  ;;  %v3718_v3 = vld [vmem:[#allocation28_spill] sm:$0xff] }
  0xbf   :  { %3701 = vst [vmem:[#allocation110_spill] sm:$0xff] %v2768_v48  ;;  %3702 = vst [vmem:[#allocation111_spill] sm:$0xff] %v2771_v6  ;;  %v2789_v10 = vadd.f32 %v2179_v23, %v952_v32  ;;  %v2792_v34 = vadd.f32 %v2185_v61, %v953_v20  ;;  %v2795_v56 = vadd.f32 %v2187_v24, %v954_v21  ;;  %v2815_v14 = vpop.permute.xlu1 %460  ;;  %v3708_v32 = vld [vmem:[#allocation23_spill] sm:$0xff]  ;;  %v3709_v21 = vld [vmem:[#allocation24_spill] sm:$0xff]  ;;  %v2821_v51 = vpop.permute.xlu0 %464 }
  0xc0   :  { %v891_v11 = vmul.f32 %v2567_v49, %v2140_v12  ;;  %v892_v26 = vmul.f32 %v2567_v49, %v2143_v54  ;;  %v893_v8 = vmul.f32 %v2567_v49, %v2148_v63  ;;  %v894_v52 = vmul.f32 %v2567_v49, %v2151_v0  ;;  %3706 = vst [vmem:[#allocation115_spill] sm:$0xff] %v2815_v14  ;;  %v3707_v49 = vld [vmem:[#allocation22_spill] sm:$0xff] }
  0xc1   :  { %3705 = vst [vmem:[#allocation114_spill] sm:$0xff] %v2795_v56  ;;  %v503_v16 = vmul.f32 %v2154_v43, %v2616_v9  ;;  %v504_v27 = vmul.f32 %v2157_v44, %v2616_v9  ;;  %v505_v28 = vmul.f32 %v2160_v2, %v2616_v9  ;;  %v506_v29 = vmul.f32 %v2163_v4, %v2616_v9 }
  0xc2   :  { %v895_v30 = vmul.f32 %v2569_v55, %v2140_v12  ;;  %v563_v15 = vsub.f32 %v2311_v53, %v499_v40  ;;  %v564_v1 = vsub.f32 %v3707_v49, %v500_v47  ;;  %v565_v20 = vsub.f32 %v3708_v32, %v501_v39  ;;  %3710 = vst [vmem:[#allocation22_spill] sm:$0xff] %v2821_v51  ;;  %v3712_v53 = vld [vmem:[#allocation15_spill] sm:$0xff]  ;;  %v3713_v47 = vld [vmem:[#allocation16_spill] sm:$0xff]  ;;  %v3714_v39 = vld [vmem:[#allocation17_spill] sm:$0xff] }
  0xc3   :  { %v566_v31 = vsub.f32 %v3709_v21, %v502_v42  ;;  %v955_v59 = vadd.f32 %v891_v11, %v3711_v37  ;;  %v896_v9 = vmul.f32 %v2569_v55, %v2143_v54  ;;  %v897_v6 = vmul.f32 %v2569_v55, %v2148_v63  ;;  %v3715_v42 = vld [vmem:[#allocation25_spill] sm:$0xff]  ;;  %v3716_v51 = vld [vmem:[#allocation26_spill] sm:$0xff]  ;;  %v3717_v37 = vld [vmem:[#allocation27_spill] sm:$0xff] }
  0xc4   :  { %v898_v14 = vmul.f32 %v2569_v55, %v2151_v0  ;;  %v956_v40 = vadd.f32 %v892_v26, %v3712_v53  ;;  %v957_v49 = vadd.f32 %v893_v8, %v3713_v47  ;;  %v958_v32 = vadd.f32 %v894_v52, %v3714_v39  ;;  %v3719_v54 = vld [vmem:[#allocation18_spill] sm:$0xff]  ;;  %v693_v52 = vpop.permute.xlu1 %692 }
  0xc5   :  { %v567_v21 = vsub.f32 %v3715_v42, %v503_v16  ;;  %v568_v48 = vsub.f32 %v3716_v51, %v504_v27  ;;  %v569_v11 = vsub.f32 %v3717_v37, %v505_v28  ;;  %v570_v25 = vsub.f32 %v3718_v3, %v506_v29  ;;  %v3720_v16 = vld [vmem:[#allocation19_spill] sm:$0xff]  ;;  %v3721_v27 = vld [vmem:[#allocation20_spill] sm:$0xff]  ;;  %v3722_v28 = vld [vmem:[#allocation21_spill] sm:$0xff] }
  0xc6   :  { %v959_v56 = vadd.f32 %v895_v30, %v3719_v54  ;;  %v2839_v63 = vadd.f32 %v2165_v45, %v563_v15  ;;  %v2842_v55 = vadd.f32 %v2167_v19, %v564_v1  ;;  %v2845_v26 = vadd.f32 %v2173_v22, %v565_v20 }
  0xc7   :  { %v2848_v8 = vadd.f32 %v2175_v58, %v566_v31  ;;  %v2851_v51 = vadd.f32 %v2177_v60, %v955_v59  ;;  %v960_v3 = vadd.f32 %v896_v9, %v3720_v16  ;;  %v961_v54 = vadd.f32 %v897_v6, %v3721_v27  ;;  %v697_v59 = vpop.permute.xlu0 %696 }
  0xc8   :  { %v962_v29 = vadd.f32 %v898_v14, %v3722_v28  ;;  %v2857_v30 = vadd.f32 %v2179_v23, %v956_v40  ;;  %v2860_v15 = vadd.f32 %v2185_v61, %v957_v49  ;;  %v2863_v1 = vadd.f32 %v2187_v24, %v958_v32  ;;  %v3723_v32 = vld [vmem:[#allocation99_spill] sm:$0xff] }
  0xc9   :  { %v2866_v31 = vadd.f32 %v2165_v45, %v567_v21  ;;  %v2869_v20 = vadd.f32 %v2167_v19, %v568_v48  ;;  %v2872_v9 = vadd.f32 %v2173_v22, %v569_v11  ;;  %v2875_v6 = vadd.f32 %v2175_v58, %v570_v25 }
  0xca   :  { %v2878_v14 = vadd.f32 %v2177_v60, %v959_v56  ;;  %v755_v53 = vsub.f32 %v2642_v17, %v693_v52  ;;  %v756_v40 = vsub.f32 %v2657_v7, %v693_v52  ;;  %v757_v47 = vsub.f32 %v2660_v41, %v693_v52  ;;  %v3724_v17 = vld [vmem:[#allocation98_spill] sm:$0xff]  ;;  %v3725_v7 = vld [vmem:[#allocation101_spill] sm:$0xff] }
  0xcb   :  { %v758_v49 = vsub.f32 %v2663_v38, %v693_v52  ;;  %v2885_v48 = vadd.f32 %v2179_v23, %v960_v3  ;;  %v2888_v39 = vadd.f32 %v2185_v61, %v961_v54  ;;  %v2891_v25 = vadd.f32 %v2187_v24, %v962_v29  ;;  %v3726_v41 = vld [vmem:[#allocation102_spill] sm:$0xff]  ;;  %v3727_v38 = vld [vmem:[#allocation103_spill] sm:$0xff]  ;;  %v1093_v52 = vpop.permute.xlu1 %1092 }
  0xcc   :  { %v2895_v56 = vmul.f32 %v2154_v43, %v3723_v32  ;;  %v759_v42 = vsub.f32 %v3724_v17, %v697_v59  ;;  %v760_v21 = vsub.f32 %v3725_v7, %v697_v59  ;;  %v761_v37 = vsub.f32 %v3726_v41, %v697_v59  ;;  %v701_v17 = vpop.permute.xlu0 %700 }
  0xcd   :  { %v762_v11 = vsub.f32 %v3727_v38, %v697_v59  ;;  %v1155_v16 = vsub.f32 %v2747_v18, %v1093_v52  ;;  %v1156_v3 = vsub.f32 %v2753_v46, %v1093_v52  ;;  %v1157_v27 = vsub.f32 %v2756_v62, %v1093_v52 }
  0xce   :  { %v1158_v54 = vsub.f32 %v2759_v13, %v1093_v52  ;;  %v1219_v28 = vmul.f32 %v755_v53, %v755_v53  ;;  %v1220_v29 = vmul.f32 %v756_v40, %v756_v40  ;;  %v1221_v43 = vmul.f32 %v757_v47, %v757_v47 }
  0xcf   :  { %v1222_v58 = vmul.f32 %v758_v49, %v758_v49  ;;  %v1283_v22 = vmul.f32 %v1155_v16, %v1155_v16  ;;  %v1284_v7 = vmul.f32 %v1156_v3, %v1156_v3  ;;  %v1285_v19 = vmul.f32 %v1157_v27, %v1157_v27  ;;  %v1097_v49 = vpop.permute.xlu1 %1096 }
  0xd0   :  { %v1286_v41 = vmul.f32 %v1158_v54, %v1158_v54  ;;  %v2907_v59 = vmul.f32 %v2157_v44, %v3723_v32  ;;  %v2911_v18 = vmul.f32 %v2160_v2, %v3723_v32  ;;  %v2915_v46 = vmul.f32 %v2163_v4, %v3723_v32 }
  0xd1   :  { %v2919_v62 = vmul.f32 %v2614_v33, %v2140_v12  ;;  %v1347_v13 = vadd.f32 %v1283_v22, %v1219_v28  ;;  %v1348_v53 = vadd.f32 %v1284_v7, %v1220_v29  ;;  %v1349_v40 = vadd.f32 %v1285_v19, %v1221_v43 }
  0xd2   :  { %v1350_v47 = vadd.f32 %v1286_v41, %v1222_v58  ;;  %v763_v38 = vsub.f32 %v2735_v57, %v701_v17  ;;  %v764_v52 = vsub.f32 %v2738_v35, %v701_v17  ;;  %v765_v16 = vsub.f32 %v2741_v36, %v701_v17  ;;  %v3728_v58 = vld [vmem:[#allocation114_spill] sm:$0xff] }
  0xd3   :  { %v766_v3 = vsub.f32 %v2744_v5, %v701_v17  ;;  %v1223_v27 = vmul.f32 %v759_v42, %v759_v42  ;;  %v1224_v54 = vmul.f32 %v760_v21, %v760_v21  ;;  %v1225_v32 = vmul.f32 %v761_v37, %v761_v37  ;;  %v1101_v29 = vpop.permute.xlu1 %1100 }
  0xd4   :  { %v1226_v4 = vmul.f32 %v762_v11, %v762_v11  ;;  %vm1411_vm4 = vcmp.le.f32.partialorder %v1347_v13, 1.0  ;;  %vm1412_vm5 = vcmp.le.f32.partialorder %v1348_v53, 1.0  ;;  %vm1413_vm6 = vcmp.le.f32.partialorder %v1349_v40, 1.0  ;;  %v705_v53 = vpop.permute.xlu0 %704 }
  0xd5   :  { %vm1414_vm7 = vcmp.le.f32.partialorder %v1350_v47, 1.0  ;;  %v1159_v43 = vsub.f32 %v2774_v50, %v1097_v49  ;;  %v1160_v19 = vsub.f32 %v2789_v10, %v1097_v49  ;;  %v1161_v22 = vsub.f32 %v2792_v34, %v1097_v49 }
  0xd6   :  { %v1162_v57 = vsub.f32 %v3728_v58, %v1097_v49  ;;  %v1227_v35 = vmul.f32 %v763_v38, %v763_v38  ;;  %v1228_v36 = vmul.f32 %v764_v52, %v764_v52  ;;  %v1229_v28 = vmul.f32 %v765_v16, %v765_v16  ;;  %v3729_v58 = vld [vmem:[#allocation36_spill] sm:$0xff] }
  0xd7   :  { %v1230_v5 = vmul.f32 %v766_v3, %v766_v3  ;;  %v1287_v42 = vmul.f32 %v1159_v43, %v1159_v43  ;;  %v1288_v21 = vmul.f32 %v1160_v19, %v1160_v19  ;;  %v1289_v37 = vmul.f32 %v1161_v22, %v1161_v22 }
  0xd8   :  { %v1290_v11 = vmul.f32 %v1162_v57, %v1162_v57  ;;  %v3591_v17 = vmov 0.0   ;;  %v1163_v16 = vsub.f32 %v2851_v51, %v1101_v29  ;;  %v1164_v3 = vsub.f32 %v2857_v30, %v1101_v29 }
  0xd9   :  { %v1738_v7 = vsel %vm1411_vm4, 1.0, %v3591_v17  ;;  %v1739_v50 = vsel %vm1412_vm5, 1.0, %v3591_v17  ;;  %v1740_v10 = vsel %vm1413_vm6, 1.0, %v3591_v17  ;;  %v1741_v34 = vsel %vm1414_vm7, 1.0, %v3591_v17 }
  0xda   :  { %v1351_v41 = vadd.f32 %v1287_v42, %v1223_v27  ;;  %v1352_v49 = vadd.f32 %v1288_v21, %v1224_v54  ;;  %v1353_v38 = vadd.f32 %v1289_v37, %v1225_v32  ;;  %v1354_v52 = vadd.f32 %v1290_v11, %v1226_v4  ;;  %v3730_v42 = vld [vmem:[#allocation7_spill] sm:$0xff]  ;;  %v3731_v37 = vld [vmem:[#allocation8_spill] sm:$0xff] }
  0xdb   :  { %v1165_v13 = vsub.f32 %v2860_v15, %v1101_v29  ;;  %v1166_v43 = vsub.f32 %v2863_v1, %v1101_v29  ;;  %v1291_v15 = vmul.f32 %v1163_v16, %v1163_v16  ;;  %v1292_v19 = vmul.f32 %v1164_v3, %v1164_v3  ;;  %v3734_v16 = vld [vmem:[#allocation110_spill] sm:$0xff] }
  0xdc   :  { %vm1415_vm8 = vcmp.le.f32.partialorder %v1351_v41, 1.0  ;;  %vm1416_vm9 = vcmp.le.f32.partialorder %v1352_v49, 1.0  ;;  %vm1417_vm10 = vcmp.le.f32.partialorder %v1353_v38, 1.0  ;;  %vm1418_vm11 = vcmp.le.f32.partialorder %v1354_v52, 1.0  ;;  %v3732_v41 = vld [vmem:[#allocation108_spill] sm:$0xff]  ;;  %v3733_v38 = vld [vmem:[#allocation109_spill] sm:$0xff] }
  0xdd   :  { %v1742_v40 = vsel %vm1415_vm8, 1.0, %v3591_v17  ;;  %v1743_v47 = vsel %vm1416_vm9, 1.0, %v3591_v17  ;;  %v1744_v32 = vsel %vm1417_vm10, 1.0, %v3591_v17  ;;  %v1745_v4 = vsel %vm1418_vm11, 1.0, %v3591_v17 }
  0xde   :  { %v1603_v51 = vadd.f32 %v1742_v40, %v1738_v7  ;;  %v1624_v27 = vadd.f32 %v1743_v47, %v1739_v50  ;;  %v1645_v30 = vadd.f32 %v1744_v32, %v1740_v10  ;;  %v1666_v54 = vadd.f32 %v1745_v4, %v1741_v34  ;;  %v709_v40 = vpop.permute.xlu0 %708  ;;  %v1105_v47 = vpop.permute.xlu1 %1104 }
  0xdf   :  { %v1293_v1 = vmul.f32 %v1165_v13, %v1165_v13  ;;  %v1294_v22 = vmul.f32 %v1166_v43, %v1166_v43  ;;  %v571_v57 = vsub.f32 %v3729_v58, %v2895_v56  ;;  %v2949_v21 = vmul.f32 %v2614_v33, %v3730_v42  ;;  %v3735_v13 = vld [vmem:[#allocation111_spill] sm:$0xff] }
  0xe0   :  { %v2953_v11 = vmul.f32 %v2614_v33, %v3731_v37  ;;  %v2957_v29 = vmul.f32 %v2614_v33, %v2151_v0  ;;  %v1355_v7 = vadd.f32 %v1291_v15, %v1227_v35  ;;  %v1356_v50 = vadd.f32 %v1292_v19, %v1228_v36 }
  0xe1   :  { %v1357_v10 = vadd.f32 %v1293_v1, %v1229_v28  ;;  %v1358_v34 = vadd.f32 %v1294_v22, %v1230_v5  ;;  %v767_v49 = vsub.f32 %v3732_v41, %v705_v53  ;;  %v768_v52 = vsub.f32 %v3733_v38, %v705_v53 }
  0xe2   :  { %v769_v3 = vsub.f32 %v3734_v16, %v705_v53  ;;  %v770_v43 = vsub.f32 %v3735_v13, %v705_v53  ;;  %vm1419_vm12 = vcmp.le.f32.partialorder %v1355_v7, 1.0  ;;  %vm1420_vm13 = vcmp.le.f32.partialorder %v1356_v50, 1.0  ;;  %v713_v41 = vpop.permute.xlu0 %712 }
  0xe3   :  { %vm1421_vm14 = vcmp.le.f32.partialorder %v1357_v10, 1.0  ;;  %vm1422_vm15 = vcmp.le.f32.partialorder %v1358_v34, 1.0  ;;  %v1746_v33 = vsel %vm1419_vm12, 1.0, %v3591_v17  ;;  %v1747_v35 = vsel %vm1420_vm13, 1.0, %v3591_v17 }
  0xe4   :  { %v1748_v36 = vsel %vm1421_vm14, 1.0, %v3591_v17  ;;  %v1749_v28 = vsel %vm1422_vm15, 1.0, %v3591_v17  ;;  %v1604_v5 = vadd.f32 %v1746_v33, %v1603_v51  ;;  %v1625_v32 = vadd.f32 %v1747_v35, %v1624_v27 }
  0xe5   :  { %v1646_v4 = vadd.f32 %v1748_v36, %v1645_v30  ;;  %v1667_v15 = vadd.f32 %v1749_v28, %v1666_v54  ;;  %v1167_v53 = vsub.f32 %v2878_v14, %v1105_v47  ;;  %v1168_v19 = vsub.f32 %v2885_v48, %v1105_v47  ;;  %v3736_v30 = vld [vmem:[#allocation40_spill] sm:$0xff]  ;;  %v3737_v48 = vld [vmem:[#allocation41_spill] sm:$0xff] }
  0xe6   :  { %v1169_v1 = vsub.f32 %v2888_v39, %v1105_v47  ;;  %v1170_v22 = vsub.f32 %v2891_v25, %v1105_v47  ;;  %v1231_v7 = vmul.f32 %v767_v49, %v767_v49  ;;  %v1232_v50 = vmul.f32 %v768_v52, %v768_v52  ;;  %v3738_v39 = vld [vmem:[#allocation42_spill] sm:$0xff] }
  0xe7   :  { %v1233_v10 = vmul.f32 %v769_v3, %v769_v3  ;;  %v1234_v34 = vmul.f32 %v770_v43, %v770_v43  ;;  %v1295_v38 = vmul.f32 %v1167_v53, %v1167_v53  ;;  %v1296_v16 = vmul.f32 %v1168_v19, %v1168_v19  ;;  %v3739_v19 = vld [vmem:[#allocation29_spill] sm:$0xff] }
  0xe8   :  { %v1297_v13 = vmul.f32 %v1169_v1, %v1169_v1  ;;  %v1298_v51 = vmul.f32 %v1170_v22, %v1170_v22  ;;  %v771_v27 = vsub.f32 %v2839_v63, %v709_v40  ;;  %v572_v14 = vsub.f32 %v3736_v30, %v2907_v59  ;;  %v3741_v1 = vld [vmem:[#allocation33_spill] sm:$0xff] }
  0xe9   :  { %v573_v54 = vsub.f32 %v3737_v48, %v2911_v18  ;;  %v574_v25 = vsub.f32 %v3738_v39, %v2915_v46  ;;  %v1359_v49 = vadd.f32 %v1295_v38, %v1231_v7  ;;  %v1360_v52 = vadd.f32 %v1296_v16, %v1232_v50  ;;  %v3742_v7 = vld [vmem:[#allocation34_spill] sm:$0xff] }
  0xea   :  { %v1361_v3 = vadd.f32 %v1297_v13, %v1233_v10  ;;  %v1362_v43 = vadd.f32 %v1298_v51, %v1234_v34  ;;  %v772_v47 = vsub.f32 %v2842_v55, %v709_v40  ;;  %v773_v33 = vsub.f32 %v2845_v26, %v709_v40  ;;  %v717_v51 = vpop.permute.xlu0 %716 }
  0xeb   :  { %v774_v35 = vsub.f32 %v2848_v8, %v709_v40  ;;  %v775_v63 = vsub.f32 %v2866_v31, %v713_v41  ;;  %vm1423_vm0 = vcmp.le.f32.partialorder %v1359_v49, 1.0  ;;  %vm1424_vm1 = vcmp.le.f32.partialorder %v1360_v52, 1.0  ;;  %v3740_v31 = vld [vmem:[#allocation32_spill] sm:$0xff] }
  0xec   :  { %vm1425_vm2 = vcmp.le.f32.partialorder %v1361_v3, 1.0  ;;  %vm1426_vm3 = vcmp.le.f32.partialorder %v1362_v43, 1.0  ;;  %v1750_v59 = vsel %vm1423_vm0, 1.0, %v3591_v17  ;;  %v1751_v18 = vsel %vm1424_vm1, 1.0, %v3591_v17 }
  0xed   :  { %v1752_v46 = vsel %vm1425_vm2, 1.0, %v3591_v17  ;;  %v1753_v36 = vsel %vm1426_vm3, 1.0, %v3591_v17  ;;  %v1605_v28 = vadd.f32 %v1750_v59, %v1604_v5  ;;  %v1626_v55 = vadd.f32 %v1751_v18, %v1625_v32  ;;  %v3745_v59 = vld [vmem:[#allocation13_spill] sm:$0xff] }
  0xee   :  { %v1647_v53 = vadd.f32 %v1752_v46, %v1646_v4  ;;  %v1668_v26 = vadd.f32 %v1753_v36, %v1667_v15  ;;  %v963_v8 = vadd.f32 %v2919_v62, %v3739_v19  ;;  %v964_v40 = vadd.f32 %v2949_v21, %v3740_v31  ;;  %v1109_v4 = vpop.permute.xlu1 %1108 }
  0xef   :  { %v965_v22 = vadd.f32 %v2953_v11, %v3741_v1  ;;  %v966_v50 = vadd.f32 %v2957_v29, %v3742_v7  ;;  %v1235_v10 = vmul.f32 %v771_v27, %v771_v27  ;;  %v776_v34 = vsub.f32 %v2869_v20, %v713_v41  ;;  %v3747_v1 = vld [vmem:[#allocation9_spill] sm:$0xff] }
  0xf0   :  { %v777_v5 = vsub.f32 %v2872_v9, %v713_v41  ;;  %v778_v32 = vsub.f32 %v2875_v6, %v713_v41  ;;  %v1043_v15 = vadd.f32 %v2177_v60, %v963_v8  ;;  %v1044_v62 = vadd.f32 %v2179_v23, %v964_v40  ;;  %v3746_v40 = vld [vmem:[#allocation100_spill] sm:$0xff] }
  0xf1   :  { %v1045_v21 = vadd.f32 %v2185_v61, %v965_v22  ;;  %v1046_v38 = vadd.f32 %v2187_v24, %v966_v50  ;;  %v1236_v11 = vmul.f32 %v772_v47, %v772_v47  ;;  %v1237_v16 = vmul.f32 %v773_v33, %v773_v33  ;;  %v3743_v47 = vld [vmem:[#allocation11_spill] sm:$0xff] }
  0xf2   :  { %v1238_v13 = vmul.f32 %v774_v35, %v774_v35  ;;  %v3001_v29 = vmul.f32 %v775_v63, %v775_v63  ;;  %v1171_v20 = vsub.f32 %v1043_v15, %v1109_v4  ;;  %v1172_v27 = vsub.f32 %v1044_v62, %v1109_v4  ;;  %v3744_v35 = vld [vmem:[#allocation12_spill] sm:$0xff] }
  0xf3   :  { %v1173_v9 = vsub.f32 %v1045_v21, %v1109_v4  ;;  %v1174_v30 = vsub.f32 %v1046_v38, %v1109_v4  ;;  %v3003_v6 = vmul.f32 %v776_v34, %v776_v34  ;;  %v3005_v41 = vmul.f32 %v777_v5, %v777_v5  ;;  %v3749_v4 = vld [vmem:[#allocation89_spill] sm:$0xff] }
  0xf4   :  { %v3007_v48 = vmul.f32 %v778_v32, %v778_v32  ;;  %v651_v39 = vadd.f32 %v2165_v45, %v571_v57  ;;  %v1299_v49 = vmul.f32 %v1171_v20, %v1171_v20  ;;  %v1300_v52 = vmul.f32 %v1172_v27, %v1172_v27  ;;  %v3750_v20 = vld [vmem:[#allocation43_spill] sm:$0xff] }
  0xf5   :  { %v1301_v3 = vmul.f32 %v1173_v9, %v1173_v9  ;;  %v1302_v43 = vmul.f32 %v1174_v30, %v1174_v30  ;;  %v652_v33 = vadd.f32 %v3743_v47, %v572_v14  ;;  %v653_v63 = vadd.f32 %v3744_v35, %v573_v54  ;;  %v3748_v14 = vld [vmem:[#allocation10_spill] sm:$0xff] }
  0xf6   :  { %v654_v18 = vadd.f32 %v3745_v59, %v574_v25  ;;  %v779_v46 = vsub.f32 %v651_v39, %v717_v51  ;;  %v1363_v36 = vadd.f32 %v1299_v49, %v1235_v10  ;;  %v1364_v19 = vadd.f32 %v1300_v52, %v1236_v11  ;;  %v3753_v9 = vld [vmem:[#allocation38_spill] sm:$0xff]  ;;  %v3754_v39 = vld [vmem:[#allocation39_spill] sm:$0xff] }
  0xf7   :  { %v1365_v8 = vadd.f32 %v1301_v3, %v1237_v16  ;;  %v1366_v31 = vadd.f32 %v1302_v43, %v1238_v13  ;;  %v511_v56 = vmul.f32 %v3747_v1, %v3746_v40  ;;  %v512_v58 = vmul.f32 %v2157_v44, %v3746_v40  ;;  %v3755_v3 = vld [vmem:[#allocation44_spill] sm:$0xff] }
  0xf8   :  { %v513_v57 = vmul.f32 %v2160_v2, %v3746_v40  ;;  %v514_v22 = vmul.f32 %v3748_v14, %v3746_v40  ;;  %vm1427_vm4 = vcmp.le.f32.partialorder %v1363_v36, 1.0  ;;  %vm1428_vm5 = vcmp.le.f32.partialorder %v1364_v19, 1.0  ;;  %v3756_v36 = vld [vmem:[#allocation45_spill] sm:$0xff] }
  0xf9   :  { %vm1429_vm6 = vcmp.le.f32.partialorder %v1365_v8, 1.0  ;;  %vm1430_vm7 = vcmp.le.f32.partialorder %v1366_v31, 1.0  ;;  %v1754_v54 = vsel %vm1427_vm4, 1.0, %v3591_v17  ;;  %v1755_v25 = vsel %vm1428_vm5, 1.0, %v3591_v17  ;;  %v3757_v8 = vld [vmem:[#allocation46_spill] sm:$0xff] }
  0xfa   :  { %v1756_v7 = vsel %vm1429_vm6, 1.0, %v3591_v17  ;;  %v1757_v50 = vsel %vm1430_vm7, 1.0, %v3591_v17  ;;  %v1606_v10 = vadd.f32 %v1754_v54, %v1605_v28  ;;  %v1627_v34 = vadd.f32 %v1755_v25, %v1626_v55  ;;  %v3751_v55 = vld [vmem:[#allocation35_spill] sm:$0xff] }
  0xfb   :  { %v1648_v5 = vadd.f32 %v1756_v7, %v1647_v53  ;;  %v1669_v32 = vadd.f32 %v1757_v50, %v1668_v26  ;;  %v903_v15 = vmul.f32 %v3749_v4, %v2140_v12  ;;  %v904_v62 = vmul.f32 %v3749_v4, %v3730_v42  ;;  %v3752_v26 = vld [vmem:[#allocation37_spill] sm:$0xff] }
  0xfc   :  { %v905_v21 = vmul.f32 %v3749_v4, %v3731_v37  ;;  %v906_v38 = vmul.f32 %v3749_v4, %v2151_v0  ;;  %v780_v11 = vsub.f32 %v652_v33, %v717_v51  ;;  %v781_v16 = vsub.f32 %v653_v63, %v717_v51  ;;  %v1113_v63 = vpop.permute.xlu1 %1112 }
  0xfd   :  { %v782_v13 = vsub.f32 %v654_v18, %v717_v51  ;;  %v575_v28 = vsub.f32 %v3750_v20, %v511_v56  ;;  %v967_v53 = vadd.f32 %v903_v15, %v3751_v55  ;;  %v968_v27 = vadd.f32 %v904_v62, %v3752_v26  ;;  %v721_v51 = vpop.permute.xlu0 %720 }
  0xfe   :  { %v969_v30 = vadd.f32 %v905_v21, %v3753_v9  ;;  %v970_v49 = vadd.f32 %v906_v38, %v3754_v39  ;;  %v3041_v52 = vmul.f32 %v779_v46, %v779_v46  ;;  %v576_v43 = vsub.f32 %v3755_v3, %v512_v58  ;;  %v3759_v3 = vld [vmem:[#allocation99_spill] sm:$0xff] }
  0xff   :  { %v577_v19 = vsub.f32 %v3756_v36, %v513_v57  ;;  %v578_v33 = vsub.f32 %v3757_v8, %v514_v22  ;;  %v1047_v18 = vadd.f32 %v2177_v60, %v967_v53  ;;  %v1048_v31 = vadd.f32 %v2179_v23, %v968_v27  ;;  %v3758_v53 = vld [vmem:[#allocation104_spill] sm:$0xff] }
 0x100   :  { %v1049_v56 = vadd.f32 %v2185_v61, %v969_v30  ;;  %v1050_v54 = vadd.f32 %v2187_v24, %v970_v49  ;;  %v3050_v25 = vmul.f32 %v780_v11, %v780_v11  ;;  %v3052_v46 = vmul.f32 %v781_v16, %v781_v16 }
 0x101   :  { %v3054_v7 = vmul.f32 %v782_v13, %v782_v13  ;;  %v655_v58 = vadd.f32 %v2165_v45, %v575_v28  ;;  %v1175_v57 = vsub.f32 %v1047_v18, %v1113_v63  ;;  %v1176_v22 = vsub.f32 %v1048_v31, %v1113_v63 }
 0x102   :  { %v1177_v50 = vsub.f32 %v1049_v56, %v1113_v63  ;;  %v1178_v4 = vsub.f32 %v1050_v54, %v1113_v63  ;;  %v656_v15 = vadd.f32 %v3743_v47, %v576_v43  ;;  %v657_v62 = vadd.f32 %v3744_v35, %v577_v19  ;;  %v3760_v56 = vld [vmem:[#allocation47_spill] sm:$0xff] }
 0x103   :  { %v658_v21 = vadd.f32 %v3745_v59, %v578_v33  ;;  %v783_v38 = vsub.f32 %v655_v58, %v721_v51  ;;  %v1303_v20 = vmul.f32 %v1175_v57, %v1175_v57  ;;  %v1304_v11 = vmul.f32 %v1176_v22, %v1176_v22  ;;  %v3761_v58 = vld [vmem:[#allocation50_spill] sm:$0xff]  ;;  %v3762_v22 = vld [vmem:[#allocation51_spill] sm:$0xff] }
 0x104   :  { %v1305_v55 = vmul.f32 %v1177_v50, %v1177_v50  ;;  %v1306_v16 = vmul.f32 %v1178_v4, %v1178_v4  ;;  %v515_v13 = vmul.f32 %v3747_v1, %v3758_v53  ;;  %v516_v28 = vmul.f32 %v2157_v44, %v3758_v53  ;;  %v3763_v4 = vld [vmem:[#allocation52_spill] sm:$0xff] }
 0x105   :  { %v517_v26 = vmul.f32 %v2160_v2, %v3758_v53  ;;  %v518_v27 = vmul.f32 %v3748_v14, %v3758_v53  ;;  %v1367_v9 = vadd.f32 %v1303_v20, %v3001_v29  ;;  %v1368_v30 = vadd.f32 %v1304_v11, %v3003_v6 }
 0x106   :  { %v1369_v39 = vadd.f32 %v1305_v55, %v3005_v41  ;;  %v1370_v49 = vadd.f32 %v1306_v16, %v3007_v48  ;;  %v907_v43 = vmul.f32 %v3759_v3, %v2140_v12  ;;  %v908_v36 = vmul.f32 %v3759_v3, %v3730_v42 }
 0x107   :  { %v909_v19 = vmul.f32 %v3759_v3, %v3731_v37  ;;  %v910_v8 = vmul.f32 %v3759_v3, %v2151_v0  ;;  %vm1431_vm8 = vcmp.le.f32.partialorder %v1367_v9, 1.0  ;;  %vm1432_vm9 = vcmp.le.f32.partialorder %v1368_v30, 1.0  ;;  %v3764_v9 = vld [vmem:[#allocation54_spill] sm:$0xff] }
 0x108   :  { %vm1433_vm10 = vcmp.le.f32.partialorder %v1369_v39, 1.0  ;;  %vm1434_vm11 = vcmp.le.f32.partialorder %v1370_v49, 1.0  ;;  %v1758_v29 = vsel %vm1431_vm8, 1.0, %v3591_v17  ;;  %v1759_v6 = vsel %vm1432_vm9, 1.0, %v3591_v17  ;;  %v1117_v39 = vpop.permute.xlu1 %1116  ;;  %v3765_v3 = vld [vmem:[#allocation58_spill] sm:$0xff] }
 0x109   :  { %v1760_v41 = vsel %vm1433_vm10, 1.0, %v3591_v17  ;;  %v1761_v48 = vsel %vm1434_vm11, 1.0, %v3591_v17  ;;  %v1607_v33 = vadd.f32 %v1758_v29, %v1606_v10  ;;  %v1628_v63 = vadd.f32 %v1759_v6, %v1627_v34 }
 0x10a   :  { %v1649_v18 = vadd.f32 %v1760_v41, %v1648_v5  ;;  %v1670_v31 = vadd.f32 %v1761_v48, %v1669_v32  ;;  %v971_v54 = vadd.f32 %v907_v43, %v3760_v56  ;;  %v972_v57 = vadd.f32 %v908_v36, %v3761_v58  ;;  %v3766_v36 = vld [vmem:[#allocation59_spill] sm:$0xff] }
 0x10b   :  { %v973_v50 = vadd.f32 %v909_v19, %v3762_v22  ;;  %v974_v20 = vadd.f32 %v910_v8, %v3763_v4  ;;  %v784_v11 = vsub.f32 %v656_v15, %v721_v51  ;;  %v785_v55 = vsub.f32 %v657_v62, %v721_v51  ;;  %v3767_v15 = vld [vmem:[#allocation60_spill] sm:$0xff] }
 0x10c   :  { %v786_v16 = vsub.f32 %v658_v21, %v721_v51  ;;  %v579_v30 = vsub.f32 %v3764_v9, %v515_v13  ;;  %v1051_v49 = vadd.f32 %v2177_v60, %v971_v54  ;;  %v1052_v10 = vadd.f32 %v2179_v23, %v972_v57  ;;  %v725_v51 = vpop.permute.xlu0 %724 }
 0x10d   :  { %v1053_v34 = vadd.f32 %v2185_v61, %v973_v50  ;;  %v1054_v5 = vadd.f32 %v2187_v24, %v974_v20  ;;  %v3093_v32 = vmul.f32 %v783_v38, %v783_v38  ;;  %v580_v43 = vsub.f32 %v3765_v3, %v516_v28 }
 0x10e   :  { %v581_v19 = vsub.f32 %v3766_v36, %v517_v26  ;;  %v582_v62 = vsub.f32 %v3767_v15, %v518_v27  ;;  %v1179_v21 = vsub.f32 %v1051_v49, %v1117_v39  ;;  %v1180_v13 = vsub.f32 %v1052_v10, %v1117_v39 }
 0x10f   :  { %v1181_v8 = vsub.f32 %v1053_v34, %v1117_v39  ;;  %v1182_v29 = vsub.f32 %v1054_v5, %v1117_v39  ;;  %v3098_v6 = vmul.f32 %v784_v11, %v784_v11  ;;  %v3100_v41 = vmul.f32 %v785_v55, %v785_v55  ;;  %v3768_v55 = vld [vmem:[#allocation105_spill] sm:$0xff] }
 0x110   :  { %v3102_v48 = vmul.f32 %v786_v16, %v786_v16  ;;  %v659_v38 = vadd.f32 %v2165_v45, %v579_v30  ;;  %v1307_v56 = vmul.f32 %v1179_v21, %v1179_v21  ;;  %v1308_v54 = vmul.f32 %v1180_v13, %v1180_v13  ;;  %v3769_v13 = vld [vmem:[#allocation61_spill] sm:$0xff] }
 0x111   :  { %v1309_v28 = vmul.f32 %v1181_v8, %v1181_v8  ;;  %v1310_v58 = vmul.f32 %v1182_v29, %v1182_v29  ;;  %v660_v26 = vadd.f32 %v3743_v47, %v580_v43  ;;  %v661_v27 = vadd.f32 %v3744_v35, %v581_v19  ;;  %v3772_v29 = vld [vmem:[#allocation56_spill] sm:$0xff] }
 0x112   :  { %v662_v57 = vadd.f32 %v3745_v59, %v582_v62  ;;  %v787_v22 = vsub.f32 %v659_v38, %v725_v51  ;;  %v1371_v50 = vadd.f32 %v1307_v56, %v3041_v52  ;;  %v1372_v4 = vadd.f32 %v1308_v54, %v3050_v25  ;;  %v3773_v56 = vld [vmem:[#allocation57_spill] sm:$0xff] }
 0x113   :  { %v1373_v20 = vadd.f32 %v1309_v28, %v3052_v46  ;;  %v1374_v11 = vadd.f32 %v1310_v58, %v3054_v7  ;;  %v519_v16 = vmul.f32 %v3747_v1, %v3768_v55  ;;  %v520_v9 = vmul.f32 %v2157_v44, %v3768_v55  ;;  %v3774_v58 = vld [vmem:[#allocation62_spill] sm:$0xff] }
 0x114   :  { %v521_v30 = vmul.f32 %v2160_v2, %v3768_v55  ;;  %v522_v39 = vmul.f32 %v3748_v14, %v3768_v55  ;;  %vm1435_vm12 = vcmp.le.f32.partialorder %v1371_v50, 1.0  ;;  %vm1436_vm13 = vcmp.le.f32.partialorder %v1372_v4, 1.0  ;;  %v3775_v4 = vld [vmem:[#allocation63_spill] sm:$0xff] }
 0x115   :  { %vm1437_vm14 = vcmp.le.f32.partialorder %v1373_v20, 1.0  ;;  %vm1438_vm15 = vcmp.le.f32.partialorder %v1374_v11, 1.0  ;;  %v1762_v52 = vsel %vm1435_vm12, 1.0, %v3591_v17  ;;  %v1763_v25 = vsel %vm1436_vm13, 1.0, %v3591_v17 }
 0x116   :  { %v1764_v46 = vsel %vm1437_vm14, 1.0, %v3591_v17  ;;  %v1765_v7 = vsel %vm1438_vm15, 1.0, %v3591_v17  ;;  %v1608_v49 = vadd.f32 %v1762_v52, %v1607_v33  ;;  %v1629_v10 = vadd.f32 %v1763_v25, %v1628_v63  ;;  %v3770_v63 = vld [vmem:[#allocation53_spill] sm:$0xff] }
 0x117   :  { %v1650_v34 = vadd.f32 %v1764_v46, %v1649_v18  ;;  %v1671_v5 = vadd.f32 %v1765_v7, %v1670_v31  ;;  %v911_v3 = vmul.f32 %v3746_v40, %v2140_v12  ;;  %v912_v43 = vmul.f32 %v3746_v40, %v3730_v42  ;;  %v3771_v31 = vld [vmem:[#allocation55_spill] sm:$0xff] }
 0x118   :  { %v913_v36 = vmul.f32 %v3746_v40, %v3731_v37  ;;  %v914_v19 = vmul.f32 %v3746_v40, %v2151_v0  ;;  %v788_v15 = vsub.f32 %v660_v26, %v725_v51  ;;  %v789_v62 = vsub.f32 %v661_v27, %v725_v51  ;;  %v3776_v40 = vld [vmem:[#allocation64_spill] sm:$0xff]  ;;  %v1121_v27 = vpop.permute.xlu1 %1120 }
 0x119   :  { %v790_v21 = vsub.f32 %v662_v57, %v725_v51  ;;  %v583_v33 = vsub.f32 %v3769_v13, %v519_v16  ;;  %v975_v18 = vadd.f32 %v911_v3, %v3770_v63  ;;  %v976_v8 = vadd.f32 %v912_v43, %v3771_v31  ;;  %v729_v51 = vpop.permute.xlu0 %728  ;;  %v3777_v31 = vld [vmem:[#allocation106_spill] sm:$0xff] }
 0x11a   :  { %v977_v38 = vadd.f32 %v913_v36, %v3772_v29  ;;  %v978_v54 = vadd.f32 %v914_v19, %v3773_v56  ;;  %v3137_v28 = vmul.f32 %v787_v22, %v787_v22  ;;  %v584_v50 = vsub.f32 %v3774_v58, %v520_v9 }
 0x11b   :  { %v585_v20 = vsub.f32 %v3775_v4, %v521_v30  ;;  %v586_v26 = vsub.f32 %v3776_v40, %v522_v39  ;;  %v1055_v57 = vadd.f32 %v2177_v60, %v975_v18  ;;  %v1056_v11 = vadd.f32 %v2179_v23, %v976_v8 }
 0x11c   :  { %v1057_v16 = vadd.f32 %v2185_v61, %v977_v38  ;;  %v1058_v52 = vadd.f32 %v2187_v24, %v978_v54  ;;  %v3146_v25 = vmul.f32 %v788_v15, %v788_v15  ;;  %v3148_v22 = vmul.f32 %v789_v62, %v789_v62 }
 0x11d   :  { %v3150_v46 = vmul.f32 %v790_v21, %v790_v21  ;;  %v663_v9 = vadd.f32 %v2165_v45, %v583_v33  ;;  %v1183_v30 = vsub.f32 %v1055_v57, %v1121_v27  ;;  %v1184_v39 = vsub.f32 %v1056_v11, %v1121_v27 }
 0x11e   :  { %v1185_v7 = vsub.f32 %v1057_v16, %v1121_v27  ;;  %v1186_v3 = vsub.f32 %v1058_v52, %v1121_v27  ;;  %v664_v43 = vadd.f32 %v3743_v47, %v584_v50  ;;  %v665_v36 = vadd.f32 %v3744_v35, %v585_v20  ;;  %v3778_v16 = vld [vmem:[#allocation65_spill] sm:$0xff] }
 0x11f   :  { %v666_v19 = vadd.f32 %v3745_v59, %v586_v26  ;;  %v791_v13 = vsub.f32 %v663_v9, %v729_v51  ;;  %v1311_v63 = vmul.f32 %v1183_v30, %v1183_v30  ;;  %v1312_v15 = vmul.f32 %v1184_v39, %v1184_v39  ;;  %v3779_v9 = vld [vmem:[#allocation66_spill] sm:$0xff]  ;;  %v3780_v30 = vld [vmem:[#allocation67_spill] sm:$0xff] }
 0x120   :  { %v1313_v18 = vmul.f32 %v1185_v7, %v1185_v7  ;;  %v1314_v62 = vmul.f32 %v1186_v3, %v1186_v3  ;;  %v523_v21 = vmul.f32 %v3747_v1, %v3777_v31  ;;  %v524_v33 = vmul.f32 %v2157_v44, %v3777_v31  ;;  %v3781_v7 = vld [vmem:[#allocation68_spill] sm:$0xff] }
 0x121   :  { %v525_v8 = vmul.f32 %v2160_v2, %v3777_v31  ;;  %v526_v29 = vmul.f32 %v3748_v14, %v3777_v31  ;;  %v1375_v38 = vadd.f32 %v1311_v63, %v3093_v32  ;;  %v1376_v56 = vadd.f32 %v1312_v15, %v3098_v6 }
 0x122   :  { %v1377_v54 = vadd.f32 %v1313_v18, %v3100_v41  ;;  %v1378_v58 = vadd.f32 %v1314_v62, %v3102_v48  ;;  %v915_v50 = vmul.f32 %v3758_v53, %v2140_v12  ;;  %v916_v4 = vmul.f32 %v3758_v53, %v3730_v42  ;;  %v3782_v62 = vld [vmem:[#allocation70_spill] sm:$0xff] }
 0x123   :  { %v917_v20 = vmul.f32 %v3758_v53, %v3731_v37  ;;  %v918_v40 = vmul.f32 %v3758_v53, %v2151_v0  ;;  %vm1439_vm0 = vcmp.le.f32.partialorder %v1375_v38, 1.0  ;;  %vm1440_vm1 = vcmp.le.f32.partialorder %v1376_v56, 1.0  ;;  %v1125_v56 = vpop.permute.xlu1 %1124 }
 0x124   :  { %vm1441_vm2 = vcmp.le.f32.partialorder %v1377_v54, 1.0  ;;  %vm1442_vm3 = vcmp.le.f32.partialorder %v1378_v58, 1.0  ;;  %v1766_v32 = vsel %vm1439_vm0, 1.0, %v3591_v17  ;;  %v1767_v6 = vsel %vm1440_vm1, 1.0, %v3591_v17  ;;  %v3783_v58 = vld [vmem:[#allocation74_spill] sm:$0xff] }
 0x125   :  { %v1768_v41 = vsel %vm1441_vm2, 1.0, %v3591_v17  ;;  %v1769_v48 = vsel %vm1442_vm3, 1.0, %v3591_v17  ;;  %v1609_v26 = vadd.f32 %v1766_v32, %v1608_v49  ;;  %v1630_v27 = vadd.f32 %v1767_v6, %v1629_v10 }
 0x126   :  { %v1651_v57 = vadd.f32 %v1768_v41, %v1650_v34  ;;  %v1672_v11 = vadd.f32 %v1769_v48, %v1671_v5  ;;  %v979_v52 = vadd.f32 %v915_v50, %v3778_v16  ;;  %v980_v53 = vadd.f32 %v916_v4, %v3779_v9  ;;  %v3784_v4 = vld [vmem:[#allocation75_spill] sm:$0xff] }
 0x127   :  { %v981_v39 = vadd.f32 %v917_v20, %v3780_v30  ;;  %v982_v3 = vadd.f32 %v918_v40, %v3781_v7  ;;  %v792_v63 = vsub.f32 %v664_v43, %v729_v51  ;;  %v793_v15 = vsub.f32 %v665_v36, %v729_v51  ;;  %v3785_v43 = vld [vmem:[#allocation76_spill] sm:$0xff] }
 0x128   :  { %v794_v18 = vsub.f32 %v666_v19, %v729_v51  ;;  %v587_v38 = vsub.f32 %v3782_v62, %v523_v21  ;;  %v1059_v54 = vadd.f32 %v2177_v60, %v979_v52  ;;  %v1060_v49 = vadd.f32 %v2179_v23, %v980_v53  ;;  %v733_v51 = vpop.permute.xlu0 %732 }
 0x129   :  { %v1061_v10 = vadd.f32 %v2185_v61, %v981_v39  ;;  %v1062_v34 = vadd.f32 %v2187_v24, %v982_v3  ;;  %v3189_v5 = vmul.f32 %v791_v13, %v791_v13  ;;  %v588_v50 = vsub.f32 %v3783_v58, %v524_v33 }
 0x12a   :  { %v589_v20 = vsub.f32 %v3784_v4, %v525_v8  ;;  %v590_v36 = vsub.f32 %v3785_v43, %v526_v29  ;;  %v1187_v19 = vsub.f32 %v1059_v54, %v1125_v56  ;;  %v1188_v21 = vsub.f32 %v1060_v49, %v1125_v56 }
 0x12b   :  { %v1189_v40 = vsub.f32 %v1061_v10, %v1125_v56  ;;  %v1190_v32 = vsub.f32 %v1062_v34, %v1125_v56  ;;  %v3194_v6 = vmul.f32 %v792_v63, %v792_v63  ;;  %v3196_v41 = vmul.f32 %v793_v15, %v793_v15  ;;  %v3786_v15 = vld [vmem:[#allocation107_spill] sm:$0xff] }
 0x12c   :  { %v3198_v48 = vmul.f32 %v794_v18, %v794_v18  ;;  %v667_v13 = vadd.f32 %v2165_v45, %v587_v38  ;;  %v1315_v16 = vmul.f32 %v1187_v19, %v1187_v19  ;;  %v1316_v52 = vmul.f32 %v1188_v21, %v1188_v21  ;;  %v3787_v21 = vld [vmem:[#allocation77_spill] sm:$0xff] }
 0x12d   :  { %v1317_v33 = vmul.f32 %v1189_v40, %v1189_v40  ;;  %v1318_v9 = vmul.f32 %v1190_v32, %v1190_v32  ;;  %v668_v8 = vadd.f32 %v3743_v47, %v588_v50  ;;  %v669_v29 = vadd.f32 %v3744_v35, %v589_v20  ;;  %v3790_v32 = vld [vmem:[#allocation72_spill] sm:$0xff] }
 0x12e   :  { %v670_v53 = vadd.f32 %v3745_v59, %v590_v36  ;;  %v795_v30 = vsub.f32 %v667_v13, %v733_v51  ;;  %v1379_v39 = vadd.f32 %v1315_v16, %v3137_v28  ;;  %v1380_v7 = vadd.f32 %v1316_v52, %v3146_v25  ;;  %v3791_v16 = vld [vmem:[#allocation73_spill] sm:$0xff] }
 0x12f   :  { %v1381_v3 = vadd.f32 %v1317_v33, %v3148_v22  ;;  %v1382_v63 = vadd.f32 %v1318_v9, %v3150_v46  ;;  %v527_v18 = vmul.f32 %v3747_v1, %v3786_v15  ;;  %v528_v62 = vmul.f32 %v2157_v44, %v3786_v15  ;;  %v3792_v9 = vld [vmem:[#allocation78_spill] sm:$0xff] }
 0x130   :  { %v529_v38 = vmul.f32 %v2160_v2, %v3786_v15  ;;  %v530_v56 = vmul.f32 %v3748_v14, %v3786_v15  ;;  %vm1443_vm4 = vcmp.le.f32.partialorder %v1379_v39, 1.0  ;;  %vm1444_vm5 = vcmp.le.f32.partialorder %v1380_v7, 1.0  ;;  %v3793_v7 = vld [vmem:[#allocation79_spill] sm:$0xff] }
 0x131   :  { %vm1445_vm6 = vcmp.le.f32.partialorder %v1381_v3, 1.0  ;;  %vm1446_vm7 = vcmp.le.f32.partialorder %v1382_v63, 1.0  ;;  %v1770_v28 = vsel %vm1443_vm4, 1.0, %v3591_v17  ;;  %v1771_v25 = vsel %vm1444_vm5, 1.0, %v3591_v17 }
 0x132   :  { %v1772_v22 = vsel %vm1445_vm6, 1.0, %v3591_v17  ;;  %v1773_v46 = vsel %vm1446_vm7, 1.0, %v3591_v17  ;;  %v1610_v54 = vadd.f32 %v1770_v28, %v1609_v26  ;;  %v1631_v49 = vadd.f32 %v1771_v25, %v1630_v27  ;;  %v3788_v27 = vld [vmem:[#allocation69_spill] sm:$0xff] }
 0x133   :  { %v1652_v10 = vadd.f32 %v1772_v22, %v1651_v57  ;;  %v1673_v34 = vadd.f32 %v1773_v46, %v1672_v11  ;;  %v919_v58 = vmul.f32 %v3768_v55, %v2140_v12  ;;  %v920_v50 = vmul.f32 %v3768_v55, %v3730_v42  ;;  %v3789_v11 = vld [vmem:[#allocation71_spill] sm:$0xff] }
 0x134   :  { %v921_v4 = vmul.f32 %v3768_v55, %v3731_v37  ;;  %v922_v20 = vmul.f32 %v3768_v55, %v2151_v0  ;;  %v796_v43 = vsub.f32 %v668_v8, %v733_v51  ;;  %v797_v36 = vsub.f32 %v669_v29, %v733_v51  ;;  %v3794_v55 = vld [vmem:[#allocation80_spill] sm:$0xff]  ;;  %v1129_v29 = vpop.permute.xlu1 %1128 }
 0x135   :  { %v798_v19 = vsub.f32 %v670_v53, %v733_v51  ;;  %v591_v26 = vsub.f32 %v3787_v21, %v527_v18  ;;  %v983_v57 = vadd.f32 %v919_v58, %v3788_v27  ;;  %v984_v40 = vadd.f32 %v920_v50, %v3789_v11  ;;  %v737_v51 = vpop.permute.xlu0 %736  ;;  %v3795_v11 = vld [vmem:[#allocation112_spill] sm:$0xff] }
 0x136   :  { %v985_v13 = vadd.f32 %v921_v4, %v3790_v32  ;;  %v986_v52 = vadd.f32 %v922_v20, %v3791_v16  ;;  %v3233_v33 = vmul.f32 %v795_v30, %v795_v30  ;;  %v592_v39 = vsub.f32 %v3792_v9, %v528_v62 }
 0x137   :  { %v593_v3 = vsub.f32 %v3793_v7, %v529_v38  ;;  %v594_v8 = vsub.f32 %v3794_v55, %v530_v56  ;;  %v1063_v53 = vadd.f32 %v2177_v60, %v983_v57  ;;  %v1064_v63 = vadd.f32 %v2179_v23, %v984_v40 }
 0x138   :  { %v1065_v18 = vadd.f32 %v2185_v61, %v985_v13  ;;  %v1066_v28 = vadd.f32 %v2187_v24, %v986_v52  ;;  %v3242_v25 = vmul.f32 %v796_v43, %v796_v43  ;;  %v3244_v30 = vmul.f32 %v797_v36, %v797_v36 }
 0x139   :  { %v3246_v22 = vmul.f32 %v798_v19, %v798_v19  ;;  %v671_v62 = vadd.f32 %v2165_v45, %v591_v26  ;;  %v1191_v38 = vsub.f32 %v1063_v53, %v1129_v29  ;;  %v1192_v56 = vsub.f32 %v1064_v63, %v1129_v29 }
 0x13a   :  { %v1193_v46 = vsub.f32 %v1065_v18, %v1129_v29  ;;  %v1194_v58 = vsub.f32 %v1066_v28, %v1129_v29  ;;  %v672_v50 = vadd.f32 %v3743_v47, %v592_v39  ;;  %v673_v4 = vadd.f32 %v3744_v35, %v593_v3  ;;  %v3796_v18 = vld [vmem:[#allocation81_spill] sm:$0xff] }
 0x13b   :  { %v674_v20 = vadd.f32 %v3745_v59, %v594_v8  ;;  %v799_v21 = vsub.f32 %v671_v62, %v737_v51  ;;  %v1319_v27 = vmul.f32 %v1191_v38, %v1191_v38  ;;  %v1320_v43 = vmul.f32 %v1192_v56, %v1192_v56  ;;  %v3797_v62 = vld [vmem:[#allocation82_spill] sm:$0xff]  ;;  %v3798_v38 = vld [vmem:[#allocation83_spill] sm:$0xff] }
 0x13c   :  { %v1321_v57 = vmul.f32 %v1193_v46, %v1193_v46  ;;  %v1322_v36 = vmul.f32 %v1194_v58, %v1194_v58  ;;  %v531_v19 = vmul.f32 %v3747_v1, %v3795_v11  ;;  %v532_v26 = vmul.f32 %v2157_v44, %v3795_v11  ;;  %v3799_v46 = vld [vmem:[#allocation84_spill] sm:$0xff] }
 0x13d   :  { %v533_v40 = vmul.f32 %v2160_v2, %v3795_v11  ;;  %v534_v32 = vmul.f32 %v3748_v14, %v3795_v11  ;;  %v1383_v13 = vadd.f32 %v1319_v27, %v3189_v5  ;;  %v1384_v16 = vadd.f32 %v1320_v43, %v3194_v6 }
 0x13e   :  { %v1385_v52 = vadd.f32 %v1321_v57, %v3196_v41  ;;  %v1386_v9 = vadd.f32 %v1322_v36, %v3198_v48  ;;  %v923_v39 = vmul.f32 %v3777_v31, %v2140_v12  ;;  %v924_v7 = vmul.f32 %v3777_v31, %v3730_v42  ;;  %v3800_v36 = vld [vmem:[#allocation85_spill] sm:$0xff] }
 0x13f   :  { %v925_v3 = vmul.f32 %v3777_v31, %v3731_v37  ;;  %v926_v55 = vmul.f32 %v3777_v31, %v2151_v0  ;;  %vm1447_vm8 = vcmp.le.f32.partialorder %v1383_v13, 1.0  ;;  %vm1448_vm9 = vcmp.le.f32.partialorder %v1384_v16, 1.0  ;;  %v1133_v16 = vpop.permute.xlu1 %1132 }
 0x140   :  { %vm1449_vm10 = vcmp.le.f32.partialorder %v1385_v52, 1.0  ;;  %vm1450_vm11 = vcmp.le.f32.partialorder %v1386_v9, 1.0  ;;  %v1774_v5 = vsel %vm1447_vm8, 1.0, %v3591_v17  ;;  %v1775_v6 = vsel %vm1448_vm9, 1.0, %v3591_v17  ;;  %v3801_v9 = vld [vmem:[#allocation86_spill] sm:$0xff] }
 0x141   :  { %v1776_v41 = vsel %vm1449_vm10, 1.0, %v3591_v17  ;;  %v1777_v48 = vsel %vm1450_vm11, 1.0, %v3591_v17  ;;  %v1611_v8 = vadd.f32 %v1774_v5, %v1610_v54  ;;  %v1632_v29 = vadd.f32 %v1775_v6, %v1631_v49 }
 0x142   :  { %v1653_v53 = vadd.f32 %v1776_v41, %v1652_v10  ;;  %v1674_v63 = vadd.f32 %v1777_v48, %v1673_v34  ;;  %v987_v28 = vadd.f32 %v923_v39, %v3796_v18  ;;  %v988_v31 = vadd.f32 %v924_v7, %v3797_v62  ;;  %v3802_v7 = vld [vmem:[#allocation87_spill] sm:$0xff] }
 0x143   :  { %v989_v56 = vadd.f32 %v925_v3, %v3798_v38  ;;  %v990_v58 = vadd.f32 %v926_v55, %v3799_v46  ;;  %v800_v27 = vsub.f32 %v672_v50, %v737_v51  ;;  %v801_v43 = vsub.f32 %v673_v4, %v737_v51  ;;  %v3803_v50 = vld [vmem:[#allocation88_spill] sm:$0xff] }
 0x144   :  { %v802_v57 = vsub.f32 %v674_v20, %v737_v51  ;;  %v595_v13 = vsub.f32 %v3800_v36, %v531_v19  ;;  %v1067_v52 = vadd.f32 %v2177_v60, %v987_v28  ;;  %v1068_v54 = vadd.f32 %v2179_v23, %v988_v31  ;;  %v741_v51 = vpop.permute.xlu0 %740 }
 0x145   :  { %v1069_v49 = vadd.f32 %v2185_v61, %v989_v56  ;;  %v1070_v10 = vadd.f32 %v2187_v24, %v990_v58  ;;  %v3285_v34 = vmul.f32 %v799_v21, %v799_v21  ;;  %v596_v39 = vsub.f32 %v3801_v9, %v532_v26 }
 0x146   :  { %v597_v3 = vsub.f32 %v3802_v7, %v533_v40  ;;  %v598_v4 = vsub.f32 %v3803_v50, %v534_v32  ;;  %v1195_v20 = vsub.f32 %v1067_v52, %v1133_v16  ;;  %v1196_v19 = vsub.f32 %v1068_v54, %v1133_v16 }
 0x147   :  { %v1197_v55 = vsub.f32 %v1069_v49, %v1133_v16  ;;  %v1198_v5 = vsub.f32 %v1070_v10, %v1133_v16  ;;  %v3290_v6 = vmul.f32 %v800_v27, %v800_v27  ;;  %v3292_v41 = vmul.f32 %v801_v43, %v801_v43  ;;  %v3804_v43 = vld [vmem:[#allocation113_spill] sm:$0xff] }
 0x148   :  { %v3294_v48 = vmul.f32 %v802_v57, %v802_v57  ;;  %v675_v21 = vadd.f32 %v2165_v45, %v595_v13  ;;  %v1323_v18 = vmul.f32 %v1195_v20, %v1195_v20  ;;  %v1324_v28 = vmul.f32 %v1196_v19, %v1196_v19  ;;  %v3805_v19 = vld [vmem:[#allocation94_spill] sm:$0xff] }
 0x149   :  { %v1325_v26 = vmul.f32 %v1197_v55, %v1197_v55  ;;  %v1326_v62 = vmul.f32 %v1198_v5, %v1198_v5  ;;  %v676_v40 = vadd.f32 %v3743_v47, %v596_v39  ;;  %v677_v32 = vadd.f32 %v3744_v35, %v597_v3  ;;  %v3808_v5 = vld [vmem:[#allocation92_spill] sm:$0xff] }
 0x14a   :  { %v678_v31 = vadd.f32 %v3745_v59, %v598_v4  ;;  %v803_v38 = vsub.f32 %v675_v21, %v741_v51  ;;  %v1387_v56 = vadd.f32 %v1323_v18, %v3233_v33  ;;  %v1388_v46 = vadd.f32 %v1324_v28, %v3242_v25  ;;  %v3809_v18 = vld [vmem:[#allocation93_spill] sm:$0xff] }
 0x14b   :  { %v1389_v58 = vadd.f32 %v1325_v26, %v3244_v30  ;;  %v1390_v27 = vadd.f32 %v1326_v62, %v3246_v22  ;;  %v535_v57 = vmul.f32 %v3747_v1, %v3804_v43  ;;  %v536_v36 = vmul.f32 %v2157_v44, %v3804_v43  ;;  %v3810_v62 = vld [vmem:[#allocation95_spill] sm:$0xff] }
 0x14c   :  { %v537_v13 = vmul.f32 %v2160_v2, %v3804_v43  ;;  %v538_v16 = vmul.f32 %v3748_v14, %v3804_v43  ;;  %vm1451_vm12 = vcmp.le.f32.partialorder %v1387_v56, 1.0  ;;  %vm1452_vm13 = vcmp.le.f32.partialorder %v1388_v46, 1.0  ;;  %v3811_v46 = vld [vmem:[#allocation96_spill] sm:$0xff] }
 0x14d   :  { %vm1453_vm14 = vcmp.le.f32.partialorder %v1389_v58, 1.0  ;;  %vm1454_vm15 = vcmp.le.f32.partialorder %v1390_v27, 1.0  ;;  %v1778_v33 = vsel %vm1451_vm12, 1.0, %v3591_v17  ;;  %v1779_v25 = vsel %vm1452_vm13, 1.0, %v3591_v17 }
 0x14e   :  { %v1780_v30 = vsel %vm1453_vm14, 1.0, %v3591_v17  ;;  %v1781_v22 = vsel %vm1454_vm15, 1.0, %v3591_v17  ;;  %v1612_v52 = vadd.f32 %v1778_v33, %v1611_v8  ;;  %v1633_v54 = vadd.f32 %v1779_v25, %v1632_v29  ;;  %v3806_v29 = vld [vmem:[#allocation90_spill] sm:$0xff] }
 0x14f   :  { %v1654_v49 = vadd.f32 %v1780_v30, %v1653_v53  ;;  %v1675_v10 = vadd.f32 %v1781_v22, %v1674_v63  ;;  %v927_v9 = vmul.f32 %v3786_v15, %v2140_v12  ;;  %v928_v39 = vmul.f32 %v3786_v15, %v3730_v42  ;;  %v3807_v63 = vld [vmem:[#allocation91_spill] sm:$0xff] }
 0x150   :  { %v929_v7 = vmul.f32 %v3786_v15, %v3731_v37  ;;  %v930_v3 = vmul.f32 %v3786_v15, %v2151_v0  ;;  %v804_v50 = vsub.f32 %v676_v40, %v741_v51  ;;  %v805_v4 = vsub.f32 %v677_v32, %v741_v51  ;;  %v3812_v15 = vld [vmem:[#allocation97_spill] sm:$0xff]  ;;  %v1137_v32 = vpop.permute.xlu1 %1136 }
 0x151   :  { %v806_v20 = vsub.f32 %v678_v31, %v741_v51  ;;  %v599_v8 = vsub.f32 %v3805_v19, %v535_v57  ;;  %v991_v53 = vadd.f32 %v927_v9, %v3806_v29  ;;  %v992_v55 = vadd.f32 %v928_v39, %v3807_v63 }
 0x152   :  { %v993_v21 = vadd.f32 %v929_v7, %v3808_v5  ;;  %v994_v28 = vadd.f32 %v930_v3, %v3809_v18  ;;  %v3329_v26 = vmul.f32 %v803_v38, %v803_v38  ;;  %v600_v56 = vsub.f32 %v3810_v62, %v536_v36  ;;  %v3813_v3 = vld [vmem:[#allocation115_spill] sm:$0xff] }
 0x153   :  { %v601_v58 = vsub.f32 %v3811_v46, %v537_v13  ;;  %v602_v40 = vsub.f32 %v3812_v15, %v538_v16  ;;  %v1071_v51 = vadd.f32 %v2177_v60, %v991_v53  ;;  %v1072_v31 = vadd.f32 %v2179_v23, %v992_v55  ;;  %v3814_v53 = vld [vmem:[#allocation49_spill] sm:$0xff] }
 0x154   :  { %v1073_v27 = vadd.f32 %v2185_v61, %v993_v21  ;;  %v1074_v57 = vadd.f32 %v2187_v24, %v994_v28  ;;  %v3338_v33 = vmul.f32 %v804_v50, %v804_v50  ;;  %v3340_v25 = vmul.f32 %v805_v4, %v805_v4 }
 0x155   :  { %v3342_v38 = vmul.f32 %v806_v20, %v806_v20  ;;  %v679_v36 = vadd.f32 %v2165_v45, %v599_v8  ;;  %v1199_v13 = vsub.f32 %v1071_v51, %v1137_v32  ;;  %v1200_v30 = vsub.f32 %v1072_v31, %v1137_v32 }
 0x156   :  { %v1201_v16 = vsub.f32 %v1073_v27, %v1137_v32  ;;  %v1202_v22 = vsub.f32 %v1074_v57, %v1137_v32  ;;  %v680_v9 = vadd.f32 %v3743_v47, %v600_v56  ;;  %v681_v39 = vadd.f32 %v3744_v35, %v601_v58 }
 0x157   :  { %v682_v7 = vadd.f32 %v3745_v59, %v602_v40  ;;  %v539_v50 = vmul.f32 %v3747_v1, %v3813_v3  ;;  %v1327_v19 = vmul.f32 %v1199_v13, %v1199_v13  ;;  %v1328_v4 = vmul.f32 %v1200_v30, %v1200_v30  ;;  %v745_v40 = vpop.permute.xlu0 %744 }
 0x158   :  { %v1329_v29 = vmul.f32 %v1201_v16, %v1201_v16  ;;  %v1330_v20 = vmul.f32 %v1202_v22, %v1202_v22  ;;  %v395_v8 = vmul.f32 %v2140_v12, %v3814_v53  ;;  %v396_v63 = vmul.f32 %v3730_v42, %v3814_v53  ;;  %v3815_v16 = vld [vmem:[#allocation31_spill] sm:$0xff] }
 0x159   :  { %v397_v55 = vmul.f32 %v3731_v37, %v3814_v53  ;;  %v398_v5 = vmul.f32 %v2151_v0, %v3814_v53  ;;  %v1391_v21 = vadd.f32 %v1327_v19, %v3285_v34  ;;  %v1392_v18 = vadd.f32 %v1328_v4, %v3290_v6 }
 0x15a   :  { %v1393_v28 = vadd.f32 %v1329_v29, %v3292_v41  ;;  %v1394_v62 = vadd.f32 %v1330_v20, %v3294_v48  ;;  %v540_v56 = vmul.f32 %v2157_v44, %v3813_v3  ;;  %v541_v46 = vmul.f32 %v2160_v2, %v3813_v3 }
 0x15b   :  { %v542_v58 = vmul.f32 %v3748_v14, %v3813_v3  ;;  %v603_v15 = vsub.f32 %v395_v8, %v539_v50  ;;  %vm1455_vm0 = vcmp.le.f32.partialorder %v1391_v21, 1.0  ;;  %vm1456_vm1 = vcmp.le.f32.partialorder %v1392_v18, 1.0  ;;  %v749_v8 = vpop.permute.xlu0 %748 }
 0x15c   :  { %vm1457_vm2 = vcmp.le.f32.partialorder %v1393_v28, 1.0  ;;  %vm1458_vm3 = vcmp.le.f32.partialorder %v1394_v62, 1.0  ;;  %v1782_v34 = vsel %vm1455_vm0, 1.0, %v3591_v17  ;;  %v1783_v6 = vsel %vm1456_vm1, 1.0, %v3591_v17 }
 0x15d   :  { %v1784_v41 = vsel %vm1457_vm2, 1.0, %v3591_v17  ;;  %v1785_v48 = vsel %vm1458_vm3, 1.0, %v3591_v17  ;;  %v3372_v32 = vadd.f32 %v1782_v34, %v1612_v52  ;;  %v3374_v51 = vadd.f32 %v1783_v6, %v1633_v54 }
 0x15e   :  { %v3376_v31 = vadd.f32 %v1784_v41, %v1654_v49  ;;  %v3378_v27 = vadd.f32 %v1785_v48, %v1675_v10  ;;  %v604_v57 = vsub.f32 %v396_v63, %v540_v56  ;;  %v605_v13 = vsub.f32 %v397_v55, %v541_v46  ;;  %v3816_v46 = vld [vmem:[#allocation22_spill] sm:$0xff] }
 0x15f   :  { %v606_v30 = vsub.f32 %v398_v5, %v542_v58  ;;  %v867_v22 = vmul.f32 %v3747_v1, %v3815_v16  ;;  %v931_v50 = vmul.f32 %v3795_v11, %v2140_v12  ;;  %v932_v19 = vmul.f32 %v3795_v11, %v3730_v42 }
 0x160   :  { %v933_v52 = vmul.f32 %v3795_v11, %v3731_v37  ;;  %v934_v54 = vmul.f32 %v3795_v11, %v2151_v0  ;;  %v807_v49 = vsub.f32 %v679_v36, %v745_v40  ;;  %v808_v10 = vsub.f32 %v680_v9, %v745_v40  ;;  %v1141_v36 = vpop.permute.xlu1 %1140 }
 0x161   :  { %v809_v4 = vsub.f32 %v681_v39, %v745_v40  ;;  %v868_v29 = vmul.f32 %v2157_v44, %v3815_v16  ;;  %v810_v20 = vsub.f32 %v682_v7, %v745_v40  ;;  %v869_v63 = vmul.f32 %v2160_v2, %v3815_v16 }
 0x162   :  { %v870_v55 = vmul.f32 %v3748_v14, %v3815_v16  ;;  %v995_v5 = vadd.f32 %v931_v50, %v867_v22  ;;  %v683_v21 = vadd.f32 %v2165_v45, %v603_v15  ;;  %v684_v18 = vadd.f32 %v3743_v47, %v604_v57 }
 0x163   :  { %v685_v11 = vadd.f32 %v3744_v35, %v605_v13  ;;  %v996_v9 = vadd.f32 %v932_v19, %v868_v29  ;;  %v686_v39 = vadd.f32 %v3745_v59, %v606_v30  ;;  %v997_v28 = vadd.f32 %v933_v52, %v869_v63  ;;  %v3817_v13 = vld [vmem:[#allocation48_spill] sm:$0xff] }
 0x164   :  { %v998_v7 = vadd.f32 %v934_v54, %v870_v55  ;;  %v1075_v62 = vadd.f32 %v2177_v60, %v995_v5  ;;  %v811_v56 = vsub.f32 %v683_v21, %v749_v8  ;;  %v543_v58 = vmul.f32 %v3747_v1, %v3816_v46 }
 0x165   :  { %v544_v40 = vmul.f32 %v2157_v44, %v3816_v46  ;;  %v545_v15 = vmul.f32 %v2160_v2, %v3816_v46  ;;  %v812_v34 = vsub.f32 %v684_v18, %v749_v8  ;;  %v813_v6 = vsub.f32 %v685_v11, %v749_v8 }
 0x166   :  { %v1203_v41 = vsub.f32 %v1075_v62, %v1141_v36  ;;  %v546_v48 = vmul.f32 %v3748_v14, %v3816_v46  ;;  %v1076_v57 = vadd.f32 %v2179_v23, %v996_v9  ;;  %v399_v30 = vmul.f32 %v2140_v12, %v3817_v13 }
 0x167   :  { %v400_v16 = vmul.f32 %v3730_v42, %v3817_v13  ;;  %v401_v22 = vmul.f32 %v3731_v37, %v3817_v13  ;;  %v814_v50 = vsub.f32 %v686_v39, %v749_v8  ;;  %v1077_v19 = vadd.f32 %v2185_v61, %v997_v28 }
 0x168   :  { %v1078_v52 = vadd.f32 %v2187_v24, %v998_v7  ;;  %v402_v54 = vmul.f32 %v2151_v0, %v3817_v13  ;;  %v1204_v29 = vsub.f32 %v1076_v57, %v1141_v36  ;;  %v607_v63 = vsub.f32 %v399_v30, %v543_v58 }
 0x169   :  { %v608_v55 = vsub.f32 %v400_v16, %v544_v40  ;;  %v609_v5 = vsub.f32 %v401_v22, %v545_v15  ;;  %v1205_v21 = vsub.f32 %v1077_v19, %v1141_v36  ;;  %v1331_v11 = vmul.f32 %v1203_v41, %v1203_v41  ;;  %v3818_v41 = vld [vmem:[#allocation30_spill] sm:$0xff]  ;;  %v1145_v16 = vpop.permute.xlu1 %1144 }
 0x16a   :  { %v1206_v18 = vsub.f32 %v1078_v52, %v1141_v36  ;;  %v610_v9 = vsub.f32 %v402_v54, %v546_v48  ;;  %v3420_v62 = vmul.f32 %v807_v49, %v807_v49  ;;  %v3422_v17 = vmul.f32 %v808_v10, %v808_v10 }
 0x16b   :  { %v3424_v8 = vmul.f32 %v809_v4, %v809_v4  ;;  %v3426_v39 = vmul.f32 %v810_v20, %v810_v20  ;;  %v3428_v28 = vmul.f32 %v811_v56, %v811_v56  ;;  %v3430_v7 = vmul.f32 %v812_v34, %v812_v34 }
 0x16c   :  { %v3432_v57 = vmul.f32 %v813_v6, %v813_v6  ;;  %v3434_v58 = vmul.f32 %v814_v50, %v814_v50  ;;  %v1332_v40 = vmul.f32 %v1204_v29, %v1204_v29  ;;  %v687_v36 = vadd.f32 %v2165_v45, %v607_v63 }
 0x16d   :  { %v688_v49 = vadd.f32 %v3743_v47, %v608_v55  ;;  %v689_v10 = vadd.f32 %v3744_v35, %v609_v5  ;;  %v1333_v15 = vmul.f32 %v1205_v21, %v1205_v21  ;;  %v1334_v4 = vmul.f32 %v1206_v18, %v1206_v18  ;;  %v753_v55 = vpop.permute.xlu0 %752 }
 0x16e   :  { %v1395_v20 = vadd.f32 %v1331_v11, %v3329_v26  ;;  %v690_v56 = vadd.f32 %v3745_v59, %v610_v9  ;;  %v871_v34 = vmul.f32 %v3747_v1, %v3818_v41  ;;  %v872_v6 = vmul.f32 %v2157_v44, %v3818_v41 }
 0x16f   :  { %v873_v48 = vmul.f32 %v2160_v2, %v3818_v41  ;;  %v874_v45 = vmul.f32 %v3748_v14, %v3818_v41  ;;  %v935_v47 = vmul.f32 %v3804_v43, %v2140_v12  ;;  %v936_v35 = vmul.f32 %v3804_v43, %v3730_v42 }
 0x170   :  { %v937_v59 = vmul.f32 %v3804_v43, %v3731_v37  ;;  %v938_v26 = vmul.f32 %v3804_v43, %v2151_v0  ;;  %v1396_v30 = vadd.f32 %v1332_v40, %v3338_v33  ;;  %v875_v22 = vmul.f32 %v3747_v1, %v3814_v53 }
 0x171   :  { %v876_v50 = vmul.f32 %v2157_v44, %v3814_v53  ;;  %v877_v19 = vmul.f32 %v2160_v2, %v3814_v53  ;;  %v999_v52 = vadd.f32 %v935_v47, %v871_v34  ;;  %v1000_v54 = vadd.f32 %v936_v35, %v872_v6 }
 0x172   :  { %v1001_v29 = vadd.f32 %v937_v59, %v873_v48  ;;  %v1002_v63 = vadd.f32 %v938_v26, %v874_v45  ;;  %v939_v43 = vmul.f32 %v3813_v3, %v2140_v12  ;;  %v940_v33 = vmul.f32 %v3813_v3, %v3730_v42 }
 0x173   :  { %v941_v5 = vmul.f32 %v3813_v3, %v3731_v37  ;;  %v942_v21 = vmul.f32 %v3813_v3, %v2151_v0  ;;  %v1397_v18 = vadd.f32 %v1333_v15, %v3340_v25  ;;  %v1398_v11 = vadd.f32 %v1334_v4, %v3342_v38  ;;  %v1149_v38 = vpop.permute.xlu1 %1148 }
 0x174   :  { %v1079_v9 = vadd.f32 %v2177_v60, %v999_v52  ;;  %v1080_v40 = vadd.f32 %v2179_v23, %v1000_v54  ;;  %v878_v41 = vmul.f32 %v3748_v14, %v3814_v53  ;;  %v1003_v34 = vadd.f32 %v939_v43, %v875_v22 }
 0x175   :  { %v1004_v6 = vadd.f32 %v940_v33, %v876_v50  ;;  %v1005_v48 = vadd.f32 %v941_v5, %v877_v19  ;;  %vm1459_vm4 = vcmp.le.f32.partialorder %v1395_v20, 1.0  ;;  %v815_v45 = vsub.f32 %v687_v36, %v753_v55 }
 0x176   :  { %v1207_v47 = vsub.f32 %v1079_v9, %v1145_v16  ;;  %v1208_v35 = vsub.f32 %v1080_v40, %v1145_v16  ;;  %vm1460_vm5 = vcmp.le.f32.partialorder %v1396_v30, 1.0  ;;  %v1081_v3 = vadd.f32 %v2185_v61, %v1001_v29 }
 0x177   :  { %v1082_v25 = vadd.f32 %v2187_v24, %v1002_v63  ;;  %v1006_v15 = vadd.f32 %v942_v21, %v878_v41  ;;  %vm1461_vm6 = vcmp.le.f32.partialorder %v1397_v18, 1.0  ;;  %v1083_v4 = vadd.f32 %v2177_v60, %v1003_v34 }
 0x178   :  { %v1084_v59 = vadd.f32 %v2179_v23, %v1004_v6  ;;  %v1085_v53 = vadd.f32 %v2185_v61, %v1005_v48  ;;  %vm1462_vm7 = vcmp.le.f32.partialorder %v1398_v11, 1.0  ;;  %v1209_v26 = vsub.f32 %v1081_v3, %v1145_v16 }
 0x179   :  { %v1210_v22 = vsub.f32 %v1082_v25, %v1145_v16  ;;  %v1335_v36 = vmul.f32 %v1207_v47, %v1207_v47  ;;  %v1336_v50 = vmul.f32 %v1208_v35, %v1208_v35  ;;  %v1211_v19 = vsub.f32 %v1083_v4, %v1149_v38 }
 0x17a   :  { %v1212_v52 = vsub.f32 %v1084_v59, %v1149_v38  ;;  %v1213_v54 = vsub.f32 %v1085_v53, %v1149_v38  ;;  %v816_v29 = vsub.f32 %v688_v49, %v753_v55  ;;  %v817_v43 = vsub.f32 %v689_v10, %v753_v55 }
 0x17b   :  { %v818_v63 = vsub.f32 %v690_v56, %v753_v55  ;;  %v1086_v33 = vadd.f32 %v2187_v24, %v1006_v15  ;;  %v3819_v5 = vmov 0.0   ;;  %v1337_v40 = vmul.f32 %v1209_v26, %v1209_v26 }
 0x17c   :  { %v1786_v21 = vsel %vm1459_vm4, 1.0, %v3819_v5  ;;  %v1787_v9 = vsel %vm1460_vm5, 1.0, %v3819_v5  ;;  %v1788_v11 = vsel %vm1461_vm6, 1.0, %v3819_v5  ;;  %v1789_v16 = vsel %vm1462_vm7, 1.0, %v3819_v5 }
 0x17d   :  { %v1338_v41 = vmul.f32 %v1210_v22, %v1210_v22  ;;  %v1399_v34 = vadd.f32 %v1335_v36, %v3420_v62  ;;  %v1214_v49 = vsub.f32 %v1086_v33, %v1149_v38  ;;  %v1400_v10 = vadd.f32 %v1336_v50, %v3422_v17 }
 0x17e   :  { %v1339_v56 = vmul.f32 %v1211_v19, %v1211_v19  ;;  %v1340_v55 = vmul.f32 %v1212_v52, %v1212_v52  ;;  %v1341_v6 = vmul.f32 %v1213_v54, %v1213_v54  ;;  %v1279_v20 = vmul.f32 %v815_v45, %v815_v45 }
 0x17f   :  { %v1280_v48 = vmul.f32 %v816_v29, %v816_v29  ;;  %v1281_v47 = vmul.f32 %v817_v43, %v817_v43  ;;  %v1282_v30 = vmul.f32 %v818_v63, %v818_v63  ;;  %v1614_v35 = vadd.f32 %v1786_v21, %v3372_v32 }
 0x180   :  { %v1635_v18 = vadd.f32 %v1787_v9, %v3374_v51  ;;  %v1656_v3 = vadd.f32 %v1788_v11, %v3376_v31  ;;  %v1677_v25 = vadd.f32 %v1789_v16, %v3378_v27  ;;  %v1401_v62 = vadd.f32 %v1337_v40, %v3424_v8 }
 0x181   :  { %v1402_v38 = vadd.f32 %v1338_v41, %v3426_v39  ;;  %vm1463_vm8 = vcmp.le.f32.partialorder %v1399_v34, 1.0  ;;  %v1342_v17 = vmul.f32 %v1214_v49, %v1214_v49  ;;  %vm1464_vm9 = vcmp.le.f32.partialorder %v1400_v10, 1.0 }
 0x182   :  { %v1403_v45 = vadd.f32 %v1339_v56, %v3428_v28  ;;  %v1404_v15 = vadd.f32 %v1340_v55, %v3430_v7  ;;  %v1405_v4 = vadd.f32 %v1341_v6, %v3432_v57  ;;  %v879_v32 = vmul.f32 %v3747_v1, %v3817_v13  ;;  %v1153_v7 = vpop.permute.xlu1 %1152 }
 0x183   :  { %v880_v51 = vmul.f32 %v2157_v44, %v3817_v13  ;;  %v881_v31 = vmul.f32 %v2160_v2, %v3817_v13  ;;  %v943_v27 = vmul.f32 %v3816_v46, %v2140_v12  ;;  %v882_v8 = vmul.f32 %v3748_v14, %v3817_v13 }
 0x184   :  { %v944_v39 = vmul.f32 %v3816_v46, %v3730_v42  ;;  %v945_v28 = vmul.f32 %v3816_v46, %v3731_v37  ;;  %v946_v1 = vmul.f32 %v3816_v46, %v2151_v0  ;;  %vm1465_vm10 = vcmp.le.f32.partialorder %v1401_v62, 1.0 }
 0x185   :  { %vm1466_vm11 = vcmp.le.f32.partialorder %v1402_v38, 1.0  ;;  %v1406_v44 = vadd.f32 %v1342_v17, %v3434_v58  ;;  %v1007_v2 = vadd.f32 %v943_v27, %v879_v32  ;;  %v1790_v12 = vsel %vm1463_vm8, 1.0, %v3819_v5 }
 0x186   :  { %v1008_v57 = vadd.f32 %v944_v39, %v880_v51  ;;  %v1009_v14 = vadd.f32 %v945_v28, %v881_v31  ;;  %v1010_v13 = vadd.f32 %v946_v1, %v882_v8  ;;  %v1791_v42 = vsel %vm1464_vm9, 1.0, %v3819_v5  ;;  %v3820_v39 = vld [vmem:[#allocation2_spill] sm:$0xff]  ;;  %v3821_v1 = vld [vmem:[#allocation3_spill] sm:$0xff] }
 0x187   :  { %vm1467_vm12 = vcmp.le.f32.partialorder %v1403_v45, 1.0  ;;  %vm1468_vm13 = vcmp.le.f32.partialorder %v1404_v15, 1.0  ;;  %v1087_v37 = vadd.f32 %v2177_v60, %v1007_v2  ;;  %vm1469_vm14 = vcmp.le.f32.partialorder %v1405_v4, 1.0  ;;  %v3822_v2 = vld [vmem:[#allocation4_spill] sm:$0xff] }
 0x188   :  { %v1088_v0 = vadd.f32 %v2179_v23, %v1008_v57  ;;  %v1089_v46 = vadd.f32 %v2185_v61, %v1009_v14  ;;  %v1090_v58 = vadd.f32 %v2187_v24, %v1010_v13  ;;  %v1792_v59 = vsel %vm1465_vm10, 1.0, %v3819_v5 }
 0x189   :  { %v1793_v53 = vsel %vm1466_vm11, 1.0, %v3819_v5  ;;  %vm1470_vm15 = vcmp.le.f32.partialorder %v1406_v44, 1.0  ;;  %v1215_v26 = vsub.f32 %v1087_v37, %v1153_v7  ;;  %v1615_v22 = vadd.f32 %v1790_v12, %v1614_v35 }
 0x18a   :  { %v1216_v36 = vsub.f32 %v1088_v0, %v1153_v7  ;;  %v1217_v50 = vsub.f32 %v1089_v46, %v1153_v7  ;;  %v1218_v19 = vsub.f32 %v1090_v58, %v1153_v7  ;;  %v1794_v60 = vsel %vm1467_vm12, 1.0, %v3819_v5  ;;  %v3823_v7 = vld [vmem:[#allocation5_spill] sm:$0xff] }
 0x18b   :  { %v1795_v23 = vsel %vm1468_vm13, 1.0, %v3819_v5  ;;  %v1796_v61 = vsel %vm1469_vm14, 1.0, %v3819_v5  ;;  %v1343_v52 = vmul.f32 %v1215_v26, %v1215_v26  ;;  %v1797_v24 = vsel %vm1470_vm15, 1.0, %v3819_v5 }
 0x18c   :  { %v1344_v54 = vmul.f32 %v1216_v36, %v1216_v36  ;;  %v1345_v29 = vmul.f32 %v1217_v50, %v1217_v50  ;;  %v1346_v43 = vmul.f32 %v1218_v19, %v1218_v19  ;;  %v1636_v63 = vadd.f32 %v1791_v42, %v1635_v18  ;;  %v3824_v50 = vld [vmem:[#allocation6_spill] sm:$0xff] }
 0x18d   :  { %v1657_v33 = vadd.f32 %v1792_v59, %v1656_v3  ;;  %v1678_v21 = vadd.f32 %v1793_v53, %v1677_v25  ;;  %v1407_v9 = vadd.f32 %v1343_v52, %v1279_v20  ;;  %v1616_v41 = vadd.f32 %v1794_v60, %v1615_v22 }
 0x18e   :  { %v1408_v11 = vadd.f32 %v1344_v54, %v1280_v48  ;;  %v1409_v16 = vadd.f32 %v1345_v29, %v1281_v47  ;;  %v1410_v40 = vadd.f32 %v1346_v43, %v1282_v30  ;;  %v1637_v34 = vadd.f32 %v1795_v23, %v1636_v63 }
 0x18f   :  { %vm1471_vm0 = vcmp.le.f32.partialorder %v1407_v9, 1.0  ;;  %v1658_v49 = vadd.f32 %v1796_v61, %v1657_v33  ;;  %v1679_v10 = vadd.f32 %v1797_v24, %v1678_v21  ;;  %v1829_v4 = vmov 1966171168  }
 0x190   :  { %vm1472_vm1 = vcmp.le.f32.partialorder %v1408_v11, 1.0  ;;  %vm1473_vm2 = vcmp.le.f32.partialorder %v1409_v16, 1.0  ;;  %vm1474_vm3 = vcmp.le.f32.partialorder %v1410_v40, 1.0  ;;  %v1798_v56 = vsel %vm1471_vm0, 1.0, %v3819_v5 }
 0x191   :  { %v1799_v55 = vsel %vm1472_vm1, 1.0, %v3819_v5  ;;  %v1800_v6 = vsel %vm1473_vm2, 1.0, %v3819_v5  ;;  %v1801_v35 = vsel %vm1474_vm3, 1.0, %v3819_v5  ;;  %v1617_v20 = vadd.f32 %v1798_v56, %v1616_v41 }
 0x192   :  { %v1638_v48 = vadd.f32 %v1799_v55, %v1637_v34  ;;  %v1659_v47 = vadd.f32 %v1800_v6, %v1658_v49  ;;  %v1680_v30 = vadd.f32 %v1801_v35, %v1679_v10  ;;  %v1706_v32 = vunpack.c.l.s4 %v1829_v4 }
 0x193   :  { %v1618_v18 = vrot.slane %v1617_v20, 4  ;;  %v1687_v5 = vand.u32 2147483647, %v3820_v39  ;;  %v1688_v44 = vand.u32 2147483647, %v3821_v1  ;;  %v3825_v21 = vlaneseq }
 0x194   :  { %v1639_v3 = vrot.slane %v1638_v48, 4  ;;  %v1660_v25 = vrot.slane %v1659_v47, 4  ;;  %v1681_v62 = vrot.slane %v1680_v30, 4  ;;  %v1689_v12 = vand.u32 2147483647, %v3822_v2 }
 0x195   :  { %v1619_v38 = vadd.f32 %v1618_v18, %v1617_v20  ;;  %v1690_v57 = vand.u32 2147483647, %v3823_v7  ;;  %v1707_v37 = vunpack.c.0.s8 %v1706_v32  ;;  %vm1691_vm4 = vcmp.gt.f32.partialorder %v1687_v5, 0.0001 }
 0x196   :  { %v1640_v17 = vadd.f32 %v1639_v3, %v1638_v48  ;;  %v1661_v45 = vadd.f32 %v1660_v25, %v1659_v47  ;;  %v1682_v15 = vadd.f32 %v1681_v62, %v1680_v30  ;;  %vm1692_vm5 = vcmp.gt.f32.partialorder %v1688_v44, 0.0001 }
 0x197   :  { %v1620_v51 = vrot.slane %v1619_v38, 2  ;;  %vm1693_vm6 = vcmp.gt.f32.partialorder %v1689_v12, 0.0001  ;;  %vm1694_vm7 = vcmp.gt.f32.partialorder %v1690_v57, 0.0001  ;;  %v1710_v19 = vsub.s32 %v1707_v37, %v3824_v50 }
 0x198   :  { %v1641_v31 = vrot.slane %v1640_v17, 2  ;;  %v1662_v27 = vrot.slane %v1661_v45, 2  ;;  %v1683_v8 = vrot.slane %v1682_v15, 2  ;;  %vm1731_vm8 = vcmp.lt.s32.totalorder %v3825_v21, 512 }
 0x199   :  { %v1621_v28 = vadd.f32 %v1620_v51, %v1619_v38 }
 0x19a   :  { %v1642_v14 = vadd.f32 %v1641_v31, %v1640_v17  ;;  %v1663_v13 = vadd.f32 %v1662_v27, %v1661_v45  ;;  %v1684_v42 = vadd.f32 %v1683_v8, %v1682_v15 }
 0x19b   :  { %v1622_v0 = vrot.slane %v1621_v28, 1 }
 0x19c   :  { %v1643_v46 = vrot.slane %v1642_v14, 1  ;;  %v1664_v58 = vrot.slane %v1663_v13, 1  ;;  %v1685_v59 = vrot.slane %v1684_v42, 1 }
 0x19d   :  { %v1623_v53 = vadd.f32 %v1622_v0, %v1621_v28 }
 0x19e   :  { %v1644_v26 = vadd.f32 %v1643_v46, %v1642_v14  ;;  %v1665_v22 = vadd.f32 %v1664_v58, %v1663_v13  ;;  %v1686_v36 = vadd.f32 %v1685_v59, %v1684_v42 }
 0x19f   :  { %v1695_v60 = vsel %vm1691_vm4, %v1623_v53, -1.0 }
 0x1a0   :  { %v1696_v23 = vsel %vm1692_vm5, %v1644_v26, -1.0  ;;  %v1697_v61 = vsel %vm1693_vm6, %v1665_v22, -1.0  ;;  %v1698_v52 = vsel %vm1694_vm7, %v1686_v36, -1.0 }
 0x1a1   :  { %v1703_v24 = vcombine.low %v1695_v60, %v1696_v23  ;;  %v1704_v54 = vcombine.low %v1697_v61, %v1698_v52 }
 0x1a3   :  { %v1711_v29 = vrot.slane %v1703_v24, %v1710_v19  ;;  %v1718_v43 = vrot.slane %v1704_v54, %v1710_v19 }
 0x1a5   :  { %v1719_v63 = vcombine.low %v1711_v29, %v1718_v43 }
 0x1a7   :  { %v1726_v33 = vrot.slane %v1719_v63, %v1710_v19 }
 0x1a9   :  { %v1727_v9 = vcombine.high %v1726_v33, %v1726_v33 }
 0x1ab   :  { %1733 = vst.msk [vmem:[%s3550_s2] sm:$0xf] %vm1731_vm8, %v1727_v9 }

</bundles_post_ra>
